<compile_context>
chip_gen: v6e
topology: v6e:2x2x1
jax: 0.10.0
libtpu: 0.0.40
codegen_flags: <defaults>
</compile_context>

<pallas_src>
import jax
import jax.numpy as jnp
from jax.experimental import pallas as pl
from jax.experimental.pallas import tpu as pltpu


# ----------------------------- kernels --------------------------------------


def _prenorm_linear_resident_kernel(x_ref, gamma_ref, beta_ref, w_ref, b_ref,
                                    o_ref):
    # x_ref: (tile_n, D); w_ref: (D, H_pad) bf16, resident across all steps.
    x = x_ref[...].astype(jnp.float32)

    # LayerNorm over last dim (biased variance, eps=1e-5, like nn.LayerNorm).
    mean = jnp.mean(x, axis=-1, keepdims=True)
    centered = x - mean
    var = jnp.mean(centered * centered, axis=-1, keepdims=True)
    inv = jax.lax.rsqrt(var + 1e-5)
    y = centered * inv * gamma_ref[...].astype(jnp.float32) \
        + beta_ref[...].astype(jnp.float32)

    # fn = Linear(dim, hidden): bf16 MXU matmul, f32 accumulation.
    out = jnp.dot(y.astype(jnp.bfloat16), w_ref[...],
                  preferred_element_type=jnp.float32)
    out = out + b_ref[...].astype(jnp.float32)
    o_ref[...] = out.astype(o_ref.dtype)


def _prenorm_linear_tiled_kernel(x_ref, gamma_ref, beta_ref, w_ref, b_ref,
                                 o_ref, y_ref):
    # x_ref: (tile_n, D); w_ref: (D, tile_h) bf16; y_ref: (tile_n, D) bf16
    # scratch carrying the normalized tile across the H-tile (j) axis.
    @pl.when(pl.program_id(1) == 0)
    def _():
        x = x_ref[...].astype(jnp.float32)
        mean = jnp.mean(x, axis=-1, keepdims=True)
        centered = x - mean
        var = jnp.mean(centered * centered, axis=-1, keepdims=True)
        inv = jax.lax.rsqrt(var + 1e-5)
        y = centered * inv * gamma_ref[...].astype(jnp.float32) \
            + beta_ref[...].astype(jnp.float32)
        y_ref[...] = y.astype(jnp.bfloat16)

    out = jnp.dot(y_ref[...], w_ref[...], preferred_element_type=jnp.float32)
    out = out + b_ref[...].astype(jnp.float32)
    o_ref[...] = out.astype(o_ref.dtype)


# --------------------------- tiling heuristics -------------------------------


def _vmem_budget_bytes():
    """75% of physical VMEM per core; conservative 48 MiB fallback (v7x)."""
    phys = 64 << 20
    try:
        info = pltpu.get_tpu_info()
        cap = getattr(info, "vmem_capacity_bytes", None)
        if cap:
            phys = int(cap)
    except Exception:
        pass
    return int(phys * 3 // 4)


def _choose_config(rows, D, H_pad, x_item, out_item, budget,
                   allow_resident=True):
    """Pick (path, tile_n, tile_h) fitting a double-buffered VMEM budget."""
    rows8 = pl.cdiv(rows, 8) * 8
    small = 4 * (2 * D * 4) + 4 * H_pad * 4   # gamma/beta/bias (generous)

    def need_resident(tn):
        return 2 * (tn * D * x_item + D * H_pad * 2 + tn * H_pad * out_item) \
            + small

    # W-resident path only when double-buffered W uses at most half the budget
    # (~<=16 MiB W on v7x, ~<=24 MiB on v5e/v6e) and a decent row tile fits.
    if allow_resident and 2 * (D * H_pad * 2) <= budget // 2:
        for tn in (1024, 512, 256):
            tn = min(tn, rows8)
            if need_resident(tn) <= budget:
                return "resident", tn, H_pad

    def need_tiled(tn, th):
        return (2 * (tn * D * x_item + D * th * 2 + tn * th * out_item)
                + tn * D * 2 + small)

    th_candidates = sorted(
        {c for c in (H_pad, 2048, 1024, 512, 256, 128)
         if c <= H_pad and H_pad % c == 0},
        reverse=True)
    min_tn = min(256, rows8)
    # Prefer wide H tiles with at least a 256-row tile ...
    for th in th_candidates:
        for tn in (1024, 512, 256):
            tn = min(tn, rows8)
            if tn >= min_tn and need_tiled(tn, th) <= budget:
                return "tiled", tn, th
    # ... then relax the row-tile floor.
    for th in th_candidates:
        for tn in (128, 64, 32, 16, 8):
            tn = min(tn, rows8)
            if need_tiled(tn, th) <= budget:
                return "tiled", tn, th
    return "tiled", min(128, rows8), 128


# ------------------------------ wrapper --------------------------------------


def prenorm_linear(x, gamma, beta, w, b, *, out_dtype=jnp.bfloat16,
                   tile_n=None, tile_h=None, force_tiled=False):
    """PreNorm(D, Linear(D, H)): x (B, N, D) -> (B, N, H), H = w.shape[1]."""
    B, N, D = x.shape
    Dw, H = w.shape
    assert Dw == D
    rows = B * N

    # bf16 weight for the MXU (no-op if the caller already passes bf16).
    w_bf16 = w if w.dtype == jnp.bfloat16 else w.astype(jnp.bfloat16)
    b_f32 = b.astype(jnp.float32)

    # Only H is padded (lane-dense output tiles); rows use Pallas edge blocks.
    H_pad = pl.cdiv(H, 128) * 128
    if H_pad != H:
        w_bf16 = jnp.pad(w_bf16, ((0, 0), (0, H_pad - H)))
        b_f32 = jnp.pad(b_f32, (0, H_pad - H))

    x2 = x.reshape(rows, D)                      # free metadata reshape
    gamma2 = gamma.reshape(1, D)
    beta2 = beta.reshape(1, D)
    b2 = b_f32.reshape(1, H_pad)

    x_item = x2.dtype.itemsize
    out_item = jnp.dtype(out_dtype).itemsize
    budget = _vmem_budget_bytes()

    path, auto_tn, auto_th = _choose_config(
        rows, D, H_pad, x_item, out_item, budget,
        allow_resident=not force_tiled)
    tn = tile_n if tile_n is not None else auto_tn
    th = tile_h if tile_h is not None else auto_th

    n_row_tiles = pl.cdiv(rows, tn)
    w_stream = D * H_pad * 2 * (1 if path == "resident" else n_row_tiles)
    cost = pl.CostEstimate(
        flops=2 * rows * D * H_pad,
        transcendentals=rows,                       # one rsqrt per row (cached)
        bytes_accessed=(rows * D * x_item + w_stream + H_pad * 4 + 2 * D * 4
                        + rows * H_pad * out_item),
    )

    if path == "resident":
        out2 = pl.pallas_call(
            _prenorm_linear_resident_kernel,
            out_shape=jax.ShapeDtypeStruct((rows, H_pad), out_dtype),
            grid_spec=pltpu.PrefetchScalarGridSpec(
                num_scalar_prefetch=0,
                grid=(n_row_tiles,),
                in_specs=[
                    pl.BlockSpec((tn, D), lambda i: (i, 0)),       # x rows
                    pl.BlockSpec((1, D), lambda i: (0, 0)),        # gamma
                    pl.BlockSpec((1, D), lambda i: (0, 0)),        # beta
                    pl.BlockSpec((D, H_pad), lambda i: (0, 0)),    # W (resident)
                    pl.BlockSpec((1, H_pad), lambda i: (0, 0)),    # bias
                ],
                out_specs=pl.BlockSpec((tn, H_pad), lambda i: (i, 0)),
            ),
            compiler_params=pltpu.CompilerParams(
                dimension_semantics=("parallel",),
                vmem_limit_bytes=budget,
            ),
            cost_estimate=cost,
        )(x2, gamma2, beta2, w_bf16, b2)
    else:
        assert H_pad % th == 0
        out2 = pl.pallas_call(
            _prenorm_linear_tiled_kernel,
            out_shape=jax.ShapeDtypeStruct((rows, H_pad), out_dtype),
            grid_spec=pltpu.PrefetchScalarGridSpec(
                num_scalar_prefetch=0,
                grid=(n_row_tiles, H_pad // th),
                in_specs=[
                    pl.BlockSpec((tn, D), lambda i, j: (i, 0)),    # x rows
                    pl.BlockSpec((1, D), lambda i, j: (0, 0)),     # gamma
                    pl.BlockSpec((1, D), lambda i, j: (0, 0)),     # beta
                    pl.BlockSpec((D, th), lambda i, j: (0, j)),    # W tile
                    pl.BlockSpec((1, th), lambda i, j: (0, j)),    # bias tile
                ],
                out_specs=pl.BlockSpec((tn, th), lambda i, j: (i, j)),
                scratch_shapes=[pltpu.VMEM((tn, D), jnp.bfloat16)],  # LN cache
            ),
            compiler_params=pltpu.CompilerParams(
                # j carries the LN scratch -> must be "arbitrary".
                dimension_semantics=("parallel", "arbitrary"),
                vmem_limit_bytes=budget,
            ),
            cost_estimate=cost,
        )(x2, gamma2, beta2, w_bf16, b2)

    if H_pad != H:
        out2 = out2[:, :H]
    return out2.reshape(B, N, H)


# ------------------------------ reference ------------------------------------


def prenorm_linear_ref(x, gamma, beta, w, b):
    xf = x.astype(jnp.float32)
    mean = jnp.mean(xf, axis=-1, keepdims=True)
    var = jnp.mean((xf - mean) ** 2, axis=-1, keepdims=True)
    xn = (xf - mean) * jax.lax.rsqrt(var + 1e-5)
    y = xn * gamma + beta
    return y @ w + b


if __name__ == "__main__":
    key = jax.random.PRNGKey(0)
    # Small shapes consistent with the module; N=200 deliberately not a
    # multiple of the row tile to exercise the Pallas edge-block path; D/H are
    # multiples of 128 so matmul / stores are lane-dense.
    B, N, D, H = 2, 200, 128, 256

    k1, k2, k3 = jax.random.split(key, 3)
    x = jax.random.normal(k1, (B, N, D), dtype=jnp.float32)

    # nn.LayerNorm(dim) init: weight=1, bias=0
    gamma = jnp.ones((D,), dtype=jnp.float32)
    beta = jnp.zeros((D,), dtype=jnp.float32)

    # Example fn = nn.Linear(D, H): deterministic small random init; weight is
    # kept in bf16 (the kernel's MXU dtype) so no per-call cast/pad is needed.
    w = (jax.random.normal(k2, (D, H), dtype=jnp.float32) * 0.02
         ).astype(jnp.bfloat16)
    b = jax.random.normal(k3, (H,), dtype=jnp.float32) * 0.02

    ref = prenorm_linear_ref(x, gamma, beta, w.astype(jnp.float32), b)

    # Default path (auto-selected; W-resident 1-D grid at these shapes).
    out = jax.block_until_ready(prenorm_linear(x, gamma, beta, w, b))
    assert out.shape == (B, N, H)
    # Mixed precision (bf16 matmul inputs / f32 acc / bf16 output) tolerance.
    assert jnp.allclose(out.astype(jnp.float32), ref, atol=5e-2, rtol=5e-2), \
        "mismatch vs reference (resident path)"

    # Also exercise the 2-D tiled path with the cached-LayerNorm scratch.
    out_tiled = jax.block_until_ready(
        prenorm_linear(x, gamma, beta, w, b, force_tiled=True, tile_h=128))
    assert jnp.allclose(out_tiled.astype(jnp.float32), ref,
                        atol=5e-2, rtol=5e-2), \
        "mismatch vs reference (tiled path)"

    print("KERNEL_OK")
</pallas_src>

<mosaic_0001>
module attributes {stable_mosaic.version = 11 : i64} {
  func.func @_prenorm_linear_resident_kernel(%arg0: i32, %arg1: memref<400x128xf32, #tpu.memory_space<vmem>>, %arg2: memref<1x128xf32, #tpu.memory_space<vmem>>, %arg3: memref<1x128xf32, #tpu.memory_space<vmem>>, %arg4: memref<128x256xbf16, #tpu.memory_space<vmem>>, %arg5: memref<1x256xf32, #tpu.memory_space<vmem>>, %arg6: memref<400x256xbf16, #tpu.memory_space<vmem>>) attributes {dimension_semantics = [#tpu.dimension_semantics<parallel>], iteration_bounds = array<i64: 1>, scalar_prefetch = 0 : i64, scratch_operands = 0 : i64, tpu.core_type = #tpu.core_type<tc>, window_params = [{transform_indices = @transform_0, window_bounds = array<i64: 400, 128>}, {pipeline_mode = #tpu.pipeline_mode<synchronous>, transform_indices = @transform_1, window_bounds = array<i64: 1, 128>}, {pipeline_mode = #tpu.pipeline_mode<synchronous>, transform_indices = @transform_2, window_bounds = array<i64: 1, 128>}, {pipeline_mode = #tpu.pipeline_mode<synchronous>, transform_indices = @transform_3, window_bounds = array<i64: 128, 256>}, {pipeline_mode = #tpu.pipeline_mode<synchronous>, transform_indices = @transform_4, window_bounds = array<i64: 1, 256>}, {transform_indices = @transform_5, window_bounds = array<i64: 400, 256>}]} {
    %c0 = arith.constant 0 : index
    %c0_0 = arith.constant 0 : index
    %0 = vector.load %arg1[%c0, %c0_0] : memref<400x128xf32, #tpu.memory_space<vmem>>, vector<400x128xf32>
    %cst = arith.constant dense<0.000000e+00> : vector<400xf32>
    %1 = vector.multi_reduction <add>, %0, %cst [1] : vector<400x128xf32> to vector<400xf32>
    %2 = vector.shape_cast %1 : vector<400xf32> to vector<400x1xf32>
    %cst_1 = arith.constant 1.280000e+02 : f32
    %3 = vector.broadcast %cst_1 : f32 to vector<400x1xf32>
    %4 = arith.divf %2, %3 : vector<400x1xf32>
    %5 = vector.broadcast %4 : vector<400x1xf32> to vector<400x128xf32>
    %6 = arith.subf %0, %5 : vector<400x128xf32>
    %7 = arith.mulf %6, %6 : vector<400x128xf32>
    %cst_2 = arith.constant dense<0.000000e+00> : vector<400xf32>
    %8 = vector.multi_reduction <add>, %7, %cst_2 [1] : vector<400x128xf32> to vector<400xf32>
    %9 = vector.shape_cast %8 : vector<400xf32> to vector<400x1xf32>
    %cst_3 = arith.constant 1.280000e+02 : f32
    %10 = vector.broadcast %cst_3 : f32 to vector<400x1xf32>
    %11 = arith.divf %9, %10 : vector<400x1xf32>
    %cst_4 = arith.constant 9.99999974E-6 : f32
    %12 = vector.broadcast %cst_4 : f32 to vector<400x1xf32>
    %13 = arith.addf %11, %12 : vector<400x1xf32>
    %14 = math.rsqrt %13 : vector<400x1xf32>
    %15 = vector.broadcast %14 : vector<400x1xf32> to vector<400x128xf32>
    %16 = arith.mulf %6, %15 : vector<400x128xf32>
    %c0_5 = arith.constant 0 : index
    %c0_6 = arith.constant 0 : index
    %17 = vector.load %arg2[%c0_5, %c0_6] : memref<1x128xf32, #tpu.memory_space<vmem>>, vector<1x128xf32>
    %18 = vector.broadcast %17 : vector<1x128xf32> to vector<400x128xf32>
    %19 = arith.mulf %16, %18 : vector<400x128xf32>
    %c0_7 = arith.constant 0 : index
    %c0_8 = arith.constant 0 : index
    %20 = vector.load %arg3[%c0_7, %c0_8] : memref<1x128xf32, #tpu.memory_space<vmem>>, vector<1x128xf32>
    %21 = vector.broadcast %20 : vector<1x128xf32> to vector<400x128xf32>
    %22 = arith.addf %19, %21 : vector<400x128xf32>
    %23 = arith.truncf %22 : vector<400x128xf32> to vector<400x128xbf16>
    %c0_9 = arith.constant 0 : index
    %c0_10 = arith.constant 0 : index
    %24 = vector.load %arg4[%c0_9, %c0_10] : memref<128x256xbf16, #tpu.memory_space<vmem>>, vector<128x256xbf16>
    %cst_11 = arith.constant dense<0.000000e+00> : vector<400x256xf32>
    %25 = tpu.matmul %23, %24, %cst_11 {dimension_numbers = #tpu.dot_dimension_numbers<[1], [0], [0], [1], [0, 0, 1, 1], [], []>} : vector<400x128xbf16>, vector<128x256xbf16>, vector<400x256xf32> -> vector<400x256xf32>
    %c0_12 = arith.constant 0 : index
    %c0_13 = arith.constant 0 : index
    %26 = vector.load %arg5[%c0_12, %c0_13] : memref<1x256xf32, #tpu.memory_space<vmem>>, vector<1x256xf32>
    %27 = vector.broadcast %26 : vector<1x256xf32> to vector<400x256xf32>
    %28 = arith.addf %25, %27 : vector<400x256xf32>
    %29 = arith.truncf %28 : vector<400x256xf32> to vector<400x256xbf16>
    %c0_14 = arith.constant 0 : index
    %c0_15 = arith.constant 0 : index
    %30 = vector.load %arg6[%c0_14, %c0_15] : memref<400x256xbf16, #tpu.memory_space<vmem>>, vector<400x256xbf16>
    tpu.vector_store %arg6[%c0_14, %c0_15], %29 {strides = array<i32>} : memref<400x256xbf16, #tpu.memory_space<vmem>>, vector<400x256xbf16>,
    return
  }
  func.func @transform_0(%arg0: i32) -> (i32, i32) {
    %c0_i32 = arith.constant 0 : i32
    %c0_i32_0 = arith.constant 0 : i32
    return %arg0, %c0_i32 : i32, i32
  }
  func.func @transform_1(%arg0: i32) -> (i32, i32) {
    %c0_i32 = arith.constant 0 : i32
    %c0_i32_0 = arith.constant 0 : i32
    %c0_i32_1 = arith.constant 0 : i32
    return %c0_i32, %c0_i32_0 : i32, i32
  }
  func.func @transform_2(%arg0: i32) -> (i32, i32) {
    %c0_i32 = arith.constant 0 : i32
    %c0_i32_0 = arith.constant 0 : i32
    %c0_i32_1 = arith.constant 0 : i32
    return %c0_i32, %c0_i32_0 : i32, i32
  }
  func.func @transform_3(%arg0: i32) -> (i32, i32) {
    %c0_i32 = arith.constant 0 : i32
    %c0_i32_0 = arith.constant 0 : i32
    %c0_i32_1 = arith.constant 0 : i32
    return %c0_i32, %c0_i32_0 : i32, i32
  }
  func.func @transform_4(%arg0: i32) -> (i32, i32) {
    %c0_i32 = arith.constant 0 : i32
    %c0_i32_0 = arith.constant 0 : i32
    %c0_i32_1 = arith.constant 0 : i32
    return %c0_i32, %c0_i32_0 : i32, i32
  }
  func.func @transform_5(%arg0: i32) -> (i32, i32) {
    %c0_i32 = arith.constant 0 : i32
    %c0_i32_0 = arith.constant 0 : i32
    return %arg0, %c0_i32 : i32, i32
  }
}

</mosaic_0001>

<bundles_post_ra>
// kernel: tpu_custom_call.1
= control target key start
LH: loop header
LB: loop body
LE: loop exit
PB: predicated region body
PF: predicated region fallthrough
CT: control target
= control target key end

     0   :  { %10 = vsyncpa [#allocation3], 0  ;;  %s2658_s0 = inlined_call_operand.hbm [shape: f32[400,128], index: 0, kind: input, shape index: {}]   ;;  %s2659_s1 = inlined_call_operand.vmem [shape: f32[1,128], index: 1, kind: input, shape index: {}]   ;;  %s2660_s2 = inlined_call_operand.hbm [shape: f32[1,128], index: 2, kind: input, shape index: {}]   ;;  %s2661_s3 = inlined_call_operand.hbm [shape: bf16[128,256], index: 3, kind: input, shape index: {}]   ;;  %s2662_s4 = inlined_call_operand.vmem [shape: f32[1,256], index: 4, kind: input, shape index: {}]   ;;  %s2663_s5 = inlined_call_operand.hbm [shape: bf16[400,256], index: 5, kind: output, shape index: {}]  }
   0x1   :  { %11 = vsyncpa [#allocation6], 0 }
   0x2   :  { %12 = vsyncpa [#allocation4], 0  ;;  %s1911_s18 = smov [#allocation5]   ;;  %s1912_s20 = smov [#allocation2]  }
   0x3   :  { %s33_s19 = sshll.u32 %s1911_s18, 4  ;;  %s18_s21 = sshll.u32 %s1912_s20, 4  ;;  %s34_s19 = int_to_ptr.vmem [resolvable:$true] %s33_s19  ;;  %s19_s21 = int_to_ptr.vmem [resolvable:$true] %s18_s21 }
   0x4   :  { %s1833_s22 = scalar_lea.vmem %s34_s19, 16  ;;  %s1837_s23 = scalar_lea.vmem %s34_s19, 32 }
   0x5   :  { %p1834_p0 = scmp.ne.s32.totalorder %s34_s19, %s1833_s22  ;;  %p1838_p1 = scmp.lt.s32.totalorder %s34_s19, %s34_s19 }
   0x6   :  { %p1839_p2 = scmp.lt.s32.totalorder %s1837_s23, %s1833_s22 }
   0x8   :  { %p1840_p3 = por %p1839_p2, %p1838_p1 }
   0xa   :  { %p1841_p4 = pnand %p1840_p3, %p1834_p0 }
   0xc   :  { %1844 = shalt.err (!%p1841_p4)
}
   0xd   :  { %36 = dma.hbm_to_vmem [thread:$0]  %s2660_s2, 16, %s34_s19, [#allocation6]  }
   0xe   :  { %s1853_s26 = scalar_lea.vmem %s19_s21, 6400  ;;  %p1858_p6 = scmp.lt.s32.totalorder %s19_s21, %s19_s21 }
   0xf   :  { %p1854_p5 = scmp.ne.s32.totalorder %s19_s21, %s1853_s26  ;;  %p1859_p7 = scmp.lt.s32.totalorder %s1853_s26, %s1853_s26 }
  0x11   :  { %p1860_p8 = por %p1859_p7, %p1858_p6 }
  0x13   :  { %p1861_p9 = pnand %p1860_p8, %p1854_p5 }
  0x15   :  { %1864 = shalt.err (!%p1861_p9)
}
  0x16   :  { %s1913_s27 = smov 128   ;;  %s1914_s28 = smov 8  }
  0x17   :  { %24 = dma.hbm_to_vmem [thread:$0]  %s2658_s0, 6400, %s19_s21, [#allocation3], %s1913_s27, %s1913_s27, %s1914_s28  }
  0x18   :  { %s1915_s6 = smov [#allocation7]  }
  0x19   :  { %s42_s7 = sshll.u32 %s1915_s6, 4  ;;  %s43_s7 = int_to_ptr.vmem [resolvable:$true] %s42_s7 }
  0x1a   :  { %s1873_s2 = scalar_lea.vmem %s43_s7, 2048  ;;  %p1878_p11 = scmp.lt.s32.totalorder %s43_s7, %s43_s7 }
  0x1b   :  { %p1874_p10 = scmp.ne.s32.totalorder %s43_s7, %s1873_s2  ;;  %p1879_p12 = scmp.lt.s32.totalorder %s1873_s2, %s1873_s2 }
  0x1d   :  { %p1880_p13 = por %p1879_p12, %p1878_p11 }
  0x1f   :  { %p1881_p0 = pnand %p1880_p13, %p1874_p10 }
  0x21   :  { %1884 = shalt.err (!%p1881_p0)
}
  0x22   :  { %48 = dma.hbm_to_vmem [thread:$0]  %s2661_s3, 2048, %s43_s7, [#allocation6], %s1913_s27, %s1913_s27, %s1914_s28  }
  0x23   :  { %1905 = dma.done.wait [#allocation3], 6400  }
  0x24   :  { %1906 = vsyncadd [#allocation3], 4294960896 }
  0x25   :  { %1907 = dma.done.wait [#allocation6], 2064  }
  0x26   :  { %1908 = vsyncadd [#allocation6], 4294965232  ;;  %v1963_v0 = vld [vmem:[#allocation2] sm:$0xff]  ;;  %v1965_v1 = vld [vmem:[#allocation2 + $0x10] sm:$0xff] }
  0x27   :  { %111 = vadd.xlane.f32.xlu0 %v1963_v0  ;;  %115 = vadd.xlane.f32.xlu1 %v1965_v1  ;;  %v1969_v2 = vld [vmem:[#allocation2 + $0x8] sm:$0xff]  ;;  %v1971_v3 = vld [vmem:[#allocation2 + $0x18] sm:$0xff]  ;;  %v1975_v4 = vld [vmem:[#allocation2 + $0xd0] sm:$0xff] }
  0x28   :  { %v1977_v5 = vld [vmem:[#allocation2 + $0xd8] sm:$0xff]  ;;  %v1981_v6 = vld [vmem:[#allocation2 + $0x20] sm:$0xff]  ;;  %v1983_v7 = vld [vmem:[#allocation2 + $0x28] sm:$0xff] }
  0x29   :  { %v1987_v8 = vld [vmem:[#allocation2 + $0xe0] sm:$0xff]  ;;  %v1989_v9 = vld [vmem:[#allocation2 + $0xe8] sm:$0xff]  ;;  %v1991_v10 = vld [vmem:[#allocation2 + $0x30] sm:$0xff] }
  0x2a   :  { %v1993_v11 = vld [vmem:[#allocation2 + $0x38] sm:$0xff]  ;;  %v1999_v12 = vld [vmem:[#allocation2 + $0xf0] sm:$0xff]  ;;  %v2005_v14 = vld [vmem:[#allocation2 + $0x40] sm:$0xff] }
  0x2b   :  { %113 = vadd.xlane.f32.xlu0 %v1969_v2  ;;  %117 = vadd.xlane.f32.xlu1 %v1971_v3  ;;  %v2001_v13 = vld [vmem:[#allocation2 + $0xf8] sm:$0xff]  ;;  %v2007_v15 = vld [vmem:[#allocation2 + $0x48] sm:$0xff]  ;;  %v2011_v16 = vld [vmem:[#allocation2 + $0x100] sm:$0xff] }
  0x2c   :  { %v2013_v17 = vld [vmem:[#allocation2 + $0x108] sm:$0xff]  ;;  %v2017_v18 = vld [vmem:[#allocation2 + $0x50] sm:$0xff]  ;;  %v2019_v19 = vld [vmem:[#allocation2 + $0x58] sm:$0xff] }
  0x2d   :  { %v2023_v20 = vld [vmem:[#allocation2 + $0x110] sm:$0xff]  ;;  %v2025_v21 = vld [vmem:[#allocation2 + $0x118] sm:$0xff]  ;;  %v2029_v22 = vld [vmem:[#allocation2 + $0x60] sm:$0xff] }
  0x2e   :  { %v2031_v23 = vld [vmem:[#allocation2 + $0x68] sm:$0xff]  ;;  %v2035_v24 = vld [vmem:[#allocation2 + $0x120] sm:$0xff]  ;;  %v2041_v26 = vld [vmem:[#allocation2 + $0x70] sm:$0xff] }
  0x2f   :  { %163 = vadd.xlane.f32.xlu0 %v1975_v4  ;;  %165 = vadd.xlane.f32.xlu1 %v1977_v5  ;;  %v2037_v25 = vld [vmem:[#allocation2 + $0x128] sm:$0xff]  ;;  %v2043_v27 = vld [vmem:[#allocation2 + $0x78] sm:$0xff]  ;;  %v2047_v28 = vld [vmem:[#allocation2 + $0x130] sm:$0xff] }
  0x30   :  { %v2049_v29 = vld [vmem:[#allocation2 + $0x138] sm:$0xff]  ;;  %v2053_v30 = vld [vmem:[#allocation2 + $0x80] sm:$0xff]  ;;  %v2055_v31 = vld [vmem:[#allocation2 + $0x88] sm:$0xff] }
  0x31   :  { %v2059_v32 = vld [vmem:[#allocation2 + $0x140] sm:$0xff]  ;;  %v2061_v33 = vld [vmem:[#allocation2 + $0x148] sm:$0xff]  ;;  %v2065_v34 = vld [vmem:[#allocation2 + $0x90] sm:$0xff] }
  0x32   :  { %v2067_v35 = vld [vmem:[#allocation2 + $0x98] sm:$0xff]  ;;  %v2071_v36 = vld [vmem:[#allocation2 + $0x150] sm:$0xff]  ;;  %v2077_v38 = vld [vmem:[#allocation2 + $0xa0] sm:$0xff] }
  0x33   :  { %119 = vadd.xlane.f32.xlu0 %v1981_v6  ;;  %121 = vadd.xlane.f32.xlu1 %v1983_v7  ;;  %v2073_v37 = vld [vmem:[#allocation2 + $0x158] sm:$0xff]  ;;  %v2079_v39 = vld [vmem:[#allocation2 + $0xa8] sm:$0xff]  ;;  %v2083_v40 = vld [vmem:[#allocation2 + $0x160] sm:$0xff] }
  0x34   :  { %v2085_v41 = vld [vmem:[#allocation2 + $0x168] sm:$0xff]  ;;  %v2089_v42 = vld [vmem:[#allocation2 + $0xb0] sm:$0xff]  ;;  %v2091_v43 = vld [vmem:[#allocation2 + $0xb8] sm:$0xff] }
  0x35   :  { %v2095_v44 = vld [vmem:[#allocation2 + $0x170] sm:$0xff]  ;;  %v2097_v45 = vld [vmem:[#allocation2 + $0x178] sm:$0xff]  ;;  %v2101_v46 = vld [vmem:[#allocation2 + $0xc0] sm:$0xff] }
  0x36   :  { %v2103_v47 = vld [vmem:[#allocation2 + $0xc8] sm:$0xff]  ;;  %v2107_v48 = vld [vmem:[#allocation2 + $0x180] sm:$0xff] }
  0x37   :  { %167 = vadd.xlane.f32.xlu0 %v1987_v8  ;;  %169 = vadd.xlane.f32.xlu1 %v1989_v9  ;;  %v2109_v49 = vld [vmem:[#allocation2 + $0x188] sm:$0xff] }
  0x38   :  { %v1701_v50 = vld [vmem:[#allocation7 + $0x74] ss:$8 sps:$4 sm:$0xff]   ;;  %v1703_v51 = vld [vmem:[#allocation7 + $0x70] ss:$8 sps:$4 sm:$0xff]  }
  0x39   :  { %909 = vmatprep.subr.bf16.mxu0 %v1701_v50  ;;  %1678 = vmatprep.subr.bf16.mxu1 %v1701_v50 }
  0x3a   :  { %910 = vmatpush1.bf16.msra.mxu0 %v1703_v51  ;;  %1686 = vmatpush1.bf16.msra.mxu1 %v1703_v51 }
  0x3b   :  { %123 = vadd.xlane.f32.xlu0 %v1991_v10  ;;  %125 = vadd.xlane.f32.xlu1 %v1993_v11 }
  0x3f   :  { %171 = vadd.xlane.f32.xlu0 %v1999_v12  ;;  %173 = vadd.xlane.f32.xlu1 %v2001_v13 }
  0x43   :  { %127 = vadd.xlane.f32.xlu0 %v2005_v14  ;;  %129 = vadd.xlane.f32.xlu1 %v2007_v15 }
  0x47   :  { %175 = vadd.xlane.f32.xlu0 %v2011_v16  ;;  %177 = vadd.xlane.f32.xlu1 %v2013_v17 }
  0x4b   :  { %131 = vadd.xlane.f32.xlu0 %v2017_v18  ;;  %133 = vadd.xlane.f32.xlu1 %v2019_v19 }
  0x4f   :  { %179 = vadd.xlane.f32.xlu0 %v2023_v20  ;;  %181 = vadd.xlane.f32.xlu1 %v2025_v21 }
  0x53   :  { %135 = vadd.xlane.f32.xlu0 %v2029_v22  ;;  %137 = vadd.xlane.f32.xlu1 %v2031_v23 }
  0x57   :  { %183 = vadd.xlane.f32.xlu0 %v2035_v24  ;;  %185 = vadd.xlane.f32.xlu1 %v2037_v25 }
  0x5b   :  { %139 = vadd.xlane.f32.xlu0 %v2041_v26  ;;  %141 = vadd.xlane.f32.xlu1 %v2043_v27 }
  0x5f   :  { %187 = vadd.xlane.f32.xlu0 %v2047_v28  ;;  %189 = vadd.xlane.f32.xlu1 %v2049_v29 }
  0x63   :  { %143 = vadd.xlane.f32.xlu0 %v2053_v30  ;;  %145 = vadd.xlane.f32.xlu1 %v2055_v31 }
  0x67   :  { %191 = vadd.xlane.f32.xlu0 %v2059_v32  ;;  %193 = vadd.xlane.f32.xlu1 %v2061_v33 }
  0x6b   :  { %147 = vadd.xlane.f32.xlu0 %v2065_v34  ;;  %149 = vadd.xlane.f32.xlu1 %v2067_v35 }
  0x6f   :  { %195 = vadd.xlane.f32.xlu0 %v2071_v36  ;;  %197 = vadd.xlane.f32.xlu1 %v2073_v37 }
  0x73   :  { %151 = vadd.xlane.f32.xlu0 %v2077_v38  ;;  %153 = vadd.xlane.f32.xlu1 %v2079_v39 }
  0x77   :  { %199 = vadd.xlane.f32.xlu0 %v2083_v40  ;;  %201 = vadd.xlane.f32.xlu1 %v2085_v41 }
  0x7b   :  { %155 = vadd.xlane.f32.xlu0 %v2089_v42  ;;  %157 = vadd.xlane.f32.xlu1 %v2091_v43 }
  0x7f   :  { %203 = vadd.xlane.f32.xlu0 %v2095_v44  ;;  %205 = vadd.xlane.f32.xlu1 %v2097_v45 }
  0x83   :  { %159 = vadd.xlane.f32.xlu0 %v2101_v46  ;;  %161 = vadd.xlane.f32.xlu1 %v2103_v47 }
  0x87   :  { %207 = vadd.xlane.f32.xlu0 %v2107_v48  ;;  %209 = vadd.xlane.f32.xlu1 %v2109_v49 }
  0xb0   :  { %v112_v52 = vpop.xlane.xlu0 %111  ;;  %v116_v53 = vpop.xlane.xlu1 %115 }
  0xb1   :  { %v212_v54 = vmul.f32 0.0078125, %v112_v52  ;;  %v214_v55 = vmul.f32 0.0078125, %v116_v53 }
  0xb3   :  { %v2114_v56 = vsub.f32 %v1963_v0, %v212_v54  ;;  %v2117_v57 = vsub.f32 %v1965_v1, %v214_v55 }
  0xb4   :  { %v114_v58 = vpop.xlane.xlu0 %113  ;;  %v118_v59 = vpop.xlane.xlu1 %117 }
  0xb5   :  { %v213_v60 = vmul.f32 0.0078125, %v114_v58  ;;  %v312_v61 = vmul.f32 %v2114_v56, %v2114_v56  ;;  %v215_v62 = vmul.f32 0.0078125, %v118_v59  ;;  %v314_v0 = vmul.f32 %v2117_v57, %v2117_v57 }
  0xb7   :  { %v2122_v63 = vsub.f32 %v1969_v2, %v213_v60  ;;  %362 = vadd.xlane.f32.xlu0 %v312_v61  ;;  %v2125_v50 = vsub.f32 %v1971_v3, %v215_v62 }
  0xb8   :  { %v164_v51 = vpop.xlane.xlu0 %163  ;;  %v166_v1 = vpop.xlane.xlu1 %165 }
  0xb9   :  { %v238_v52 = vmul.f32 0.0078125, %v164_v51  ;;  %v313_v53 = vmul.f32 %v2122_v63, %v2122_v63  ;;  %v239_v54 = vmul.f32 0.0078125, %v166_v1  ;;  %v315_v3 = vmul.f32 %v2125_v50, %v2125_v50 }
  0xbb   :  { %v2132_v55 = vsub.f32 %v1975_v4, %v238_v52  ;;  %366 = vadd.xlane.f32.xlu0 %v314_v0  ;;  %364 = vadd.xlane.f32.xlu1 %v313_v53  ;;  %v2135_v2 = vsub.f32 %v1977_v5, %v239_v54 }
  0xbc   :  { %v120_v58 = vpop.xlane.xlu0 %119  ;;  %v122_v59 = vpop.xlane.xlu1 %121 }
  0xbd   :  { %v216_v60 = vmul.f32 0.0078125, %v120_v58  ;;  %v338_v61 = vmul.f32 %v2132_v55, %v2132_v55  ;;  %v217_v62 = vmul.f32 0.0078125, %v122_v59  ;;  %v339_v5 = vmul.f32 %v2135_v2, %v2135_v2  ;;  %v1704_v58 = vld [vmem:[#allocation7 + $0x64] ss:$8 sps:$4 sm:$0xff]   ;;  %v1706_v59 = vld [vmem:[#allocation7 + $0x60] ss:$8 sps:$4 sm:$0xff]  }
  0xbe   :  { %911 = vmatprep.subr.bf16.mxu0 %v1704_v58  ;;  %1679 = vmatprep.subr.bf16.mxu1 %v1704_v58 }
  0xbf   :  { %v2142_v51 = vsub.f32 %v1981_v6, %v216_v60  ;;  %368 = vadd.xlane.f32.xlu1 %v315_v3  ;;  %414 = vadd.xlane.f32.xlu0 %v338_v61  ;;  %v2145_v4 = vsub.f32 %v1983_v7, %v217_v62 }
  0xc0   :  { %v168_v0 = vpop.xlane.xlu0 %167  ;;  %v170_v1 = vpop.xlane.xlu1 %169  ;;  %912 = vmatpush1.bf16.msra.mxu0 %v1706_v59  ;;  %1687 = vmatpush1.bf16.msra.mxu1 %v1706_v59 }
  0xc1   :  { %v240_v52 = vmul.f32 0.0078125, %v168_v0  ;;  %v316_v53 = vmul.f32 %v2142_v51, %v2142_v51  ;;  %v241_v54 = vmul.f32 0.0078125, %v170_v1  ;;  %v317_v3 = vmul.f32 %v2145_v4, %v2145_v4 }
  0xc3   :  { %v2152_v6 = vsub.f32 %v1987_v8, %v240_v52  ;;  %416 = vadd.xlane.f32.xlu1 %v339_v5  ;;  %370 = vadd.xlane.f32.xlu0 %v316_v53  ;;  %v2155_v7 = vsub.f32 %v1989_v9, %v241_v54  ;;  %v1707_v8 = vld [vmem:[#allocation7 + $0x54] ss:$8 sps:$4 sm:$0xff]   ;;  %v1709_v53 = vld [vmem:[#allocation7 + $0x50] ss:$8 sps:$4 sm:$0xff]  }
  0xc4   :  { %v124_v60 = vpop.xlane.xlu0 %123  ;;  %v126_v61 = vpop.xlane.xlu1 %125  ;;  %913 = vmatprep.subr.bf16.mxu0 %v1707_v8  ;;  %1680 = vmatprep.subr.bf16.mxu1 %v1707_v8 }
  0xc5   :  { %v218_v62 = vmul.f32 0.0078125, %v124_v60  ;;  %v340_v0 = vmul.f32 %v2152_v6, %v2152_v6  ;;  %v219_v1 = vmul.f32 0.0078125, %v126_v61  ;;  %v341_v52 = vmul.f32 %v2155_v7, %v2155_v7  ;;  %914 = vmatpush1.bf16.msra.mxu0 %v1709_v53  ;;  %1688 = vmatpush1.bf16.msra.mxu1 %v1709_v53 }
  0xc7   :  { %v2162_v5 = vsub.f32 %v1991_v10, %v218_v62  ;;  %372 = vadd.xlane.f32.xlu1 %v317_v3  ;;  %418 = vadd.xlane.f32.xlu0 %v340_v0  ;;  %v2165_v9 = vsub.f32 %v1993_v11, %v219_v1  ;;  %v1710_v10 = vld [vmem:[#allocation7 + $0x44] ss:$8 sps:$4 sm:$0xff]   ;;  %v1712_v0 = vld [vmem:[#allocation7 + $0x40] ss:$8 sps:$4 sm:$0xff]  }
  0xc8   :  { %v172_v54 = vpop.xlane.xlu0 %171  ;;  %v174_v58 = vpop.xlane.xlu1 %173  ;;  %915 = vmatprep.subr.bf16.mxu0 %v1710_v10  ;;  %1681 = vmatprep.subr.bf16.mxu1 %v1710_v10 }
  0xc9   :  { %v242_v60 = vmul.f32 0.0078125, %v172_v54  ;;  %v318_v59 = vmul.f32 %v2162_v5, %v2162_v5  ;;  %v243_v61 = vmul.f32 0.0078125, %v174_v58  ;;  %v319_v62 = vmul.f32 %v2165_v9, %v2165_v9  ;;  %916 = vmatpush1.bf16.msra.mxu0 %v1712_v0  ;;  %1689 = vmatpush1.bf16.msra.mxu1 %v1712_v0 }
  0xcb   :  { %v2172_v3 = vsub.f32 %v1999_v12, %v242_v60  ;;  %420 = vadd.xlane.f32.xlu1 %v341_v52  ;;  %374 = vadd.xlane.f32.xlu0 %v318_v59  ;;  %v2175_v11 = vsub.f32 %v2001_v13, %v243_v61  ;;  %v1713_v12 = vld [vmem:[#allocation7 + $0x34] ss:$8 sps:$4 sm:$0xff]   ;;  %v1715_v59 = vld [vmem:[#allocation7 + $0x30] ss:$8 sps:$4 sm:$0xff]  }
  0xcc   :  { %v128_v1 = vpop.xlane.xlu0 %127  ;;  %v130_v8 = vpop.xlane.xlu1 %129  ;;  %917 = vmatprep.subr.bf16.mxu0 %v1713_v12  ;;  %1682 = vmatprep.subr.bf16.mxu1 %v1713_v12 }
  0xcd   :  { %v220_v54 = vmul.f32 0.0078125, %v128_v1  ;;  %v342_v53 = vmul.f32 %v2172_v3, %v2172_v3  ;;  %v221_v58 = vmul.f32 0.0078125, %v130_v8  ;;  %v343_v60 = vmul.f32 %v2175_v11, %v2175_v11  ;;  %918 = vmatpush1.bf16.msra.mxu0 %v1715_v59  ;;  %1690 = vmatpush1.bf16.msra.mxu1 %v1715_v59 }
  0xcf   :  { %v2182_v52 = vsub.f32 %v2005_v14, %v220_v54  ;;  %376 = vadd.xlane.f32.xlu1 %v319_v62  ;;  %422 = vadd.xlane.f32.xlu0 %v342_v53  ;;  %v2185_v13 = vsub.f32 %v2007_v15, %v221_v58  ;;  %v1716_v14 = vld [vmem:[#allocation7 + $0x24] ss:$8 sps:$4 sm:$0xff]   ;;  %v1718_v53 = vld [vmem:[#allocation7 + $0x20] ss:$8 sps:$4 sm:$0xff]  }
  0xd0   :  { %v176_v61 = vpop.xlane.xlu0 %175  ;;  %v178_v10 = vpop.xlane.xlu1 %177  ;;  %919 = vmatprep.subr.bf16.mxu0 %v1716_v14  ;;  %1683 = vmatprep.subr.bf16.mxu1 %v1716_v14 }
  0xd1   :  { %v244_v1 = vmul.f32 0.0078125, %v176_v61  ;;  %v320_v0 = vmul.f32 %v2182_v52, %v2182_v52  ;;  %v245_v8 = vmul.f32 0.0078125, %v178_v10  ;;  %v321_v54 = vmul.f32 %v2185_v13, %v2185_v13  ;;  %920 = vmatpush1.bf16.msra.mxu0 %v1718_v53  ;;  %1691 = vmatpush1.bf16.msra.mxu1 %v1718_v53 }
  0xd3   :  { %v2192_v62 = vsub.f32 %v2011_v16, %v244_v1  ;;  %424 = vadd.xlane.f32.xlu1 %v343_v60  ;;  %378 = vadd.xlane.f32.xlu0 %v320_v0  ;;  %v2195_v15 = vsub.f32 %v2013_v17, %v245_v8  ;;  %v1719_v16 = vld [vmem:[#allocation7 + $0x14] ss:$8 sps:$4 sm:$0xff]   ;;  %v1721_v0 = vld [vmem:[#allocation7 + $0x10] ss:$8 sps:$4 sm:$0xff]  }
  0xd4   :  { %v132_v58 = vpop.xlane.xlu0 %131  ;;  %v134_v12 = vpop.xlane.xlu1 %133  ;;  %921 = vmatprep.subr.bf16.mxu0 %v1719_v16  ;;  %1684 = vmatprep.subr.bf16.mxu1 %v1719_v16 }
  0xd5   :  { %v222_v61 = vmul.f32 0.0078125, %v132_v58  ;;  %v344_v59 = vmul.f32 %v2192_v62, %v2192_v62  ;;  %v223_v10 = vmul.f32 0.0078125, %v134_v12  ;;  %v345_v1 = vmul.f32 %v2195_v15, %v2195_v15  ;;  %922 = vmatpush1.bf16.msra.mxu0 %v1721_v0  ;;  %1692 = vmatpush1.bf16.msra.mxu1 %v1721_v0 }
  0xd7   :  { %v2202_v60 = vsub.f32 %v2017_v18, %v222_v61  ;;  %380 = vadd.xlane.f32.xlu1 %v321_v54  ;;  %426 = vadd.xlane.f32.xlu0 %v344_v59  ;;  %v2205_v17 = vsub.f32 %v2019_v19, %v223_v10  ;;  %v1722_v18 = vld [vmem:[#allocation7 + $0x4] ss:$8 sps:$4 sm:$0xff]   ;;  %v1724_v59 = vld [vmem:[#allocation7] ss:$8 sps:$4 sm:$0xff]  }
  0xd8   :  { %v180_v8 = vpop.xlane.xlu0 %179  ;;  %v182_v14 = vpop.xlane.xlu1 %181  ;;  %923 = vmatprep.subr.bf16.mxu0 %v1722_v18  ;;  %1685 = vmatprep.subr.bf16.mxu1 %v1722_v18 }
  0xd9   :  { %v246_v58 = vmul.f32 0.0078125, %v180_v8  ;;  %v322_v53 = vmul.f32 %v2202_v60, %v2202_v60  ;;  %v247_v12 = vmul.f32 0.0078125, %v182_v14  ;;  %v323_v61 = vmul.f32 %v2205_v17, %v2205_v17  ;;  %924 = vmatpush1.bf16.msra.mxu0 %v1724_v59  ;;  %1693 = vmatpush1.bf16.msra.mxu1 %v1724_v59 }
  0xdb   :  { %v2212_v54 = vsub.f32 %v2023_v20, %v246_v58  ;;  %428 = vadd.xlane.f32.xlu1 %v345_v1  ;;  %382 = vadd.xlane.f32.xlu0 %v322_v53  ;;  %v2215_v19 = vsub.f32 %v2025_v21, %v247_v12  ;;  %v2664_v12 = vmov 0  }
  0xdc   :  { %v136_v10 = vpop.xlane.xlu0 %135  ;;  %v138_v16 = vpop.xlane.xlu1 %137  ;;  %941 = vmatprep.mubr.bf16.mxu0 %v2664_v12  ;;  %1071 = vmatprep.mubr.bf16.mxu1 %v2664_v12 }
  0xdd   :  { %v224_v8 = vmul.f32 0.0078125, %v136_v10  ;;  %v346_v0 = vmul.f32 %v2212_v54, %v2212_v54  ;;  %v225_v14 = vmul.f32 0.0078125, %v138_v16  ;;  %v347_v1 = vmul.f32 %v2215_v19, %v2215_v19 }
  0xdf   :  { %v2222_v20 = vsub.f32 %v2029_v22, %v224_v8  ;;  %384 = vadd.xlane.f32.xlu1 %v323_v61  ;;  %430 = vadd.xlane.f32.xlu0 %v346_v0  ;;  %v2225_v21 = vsub.f32 %v2031_v23, %v225_v14 }
  0xe0   :  { %v184_v58 = vpop.xlane.xlu0 %183  ;;  %v186_v53 = vpop.xlane.xlu1 %185 }
  0xe1   :  { %v248_v18 = vmul.f32 0.0078125, %v184_v58  ;;  %v324_v22 = vmul.f32 %v2222_v20, %v2222_v20  ;;  %v249_v59 = vmul.f32 0.0078125, %v186_v53  ;;  %v325_v10 = vmul.f32 %v2225_v21, %v2225_v21 }
  0xe3   :  { %v2234_v61 = vsub.f32 %v2035_v24, %v248_v18  ;;  %432 = vadd.xlane.f32.xlu1 %v347_v1  ;;  %386 = vadd.xlane.f32.xlu0 %v324_v22  ;;  %v2237_v23 = vsub.f32 %v2037_v25, %v249_v59 }
  0xe4   :  { %v140_v16 = vpop.xlane.xlu0 %139  ;;  %v142_v8 = vpop.xlane.xlu1 %141 }
  0xe5   :  { %v226_v0 = vmul.f32 0.0078125, %v140_v16  ;;  %v348_v14 = vmul.f32 %v2234_v61, %v2234_v61  ;;  %v227_v58 = vmul.f32 0.0078125, %v142_v8  ;;  %v349_v25 = vmul.f32 %v2237_v23, %v2237_v23 }
  0xe7   :  { %v2244_v53 = vsub.f32 %v2041_v26, %v226_v0  ;;  %388 = vadd.xlane.f32.xlu1 %v325_v10  ;;  %434 = vadd.xlane.f32.xlu0 %v348_v14  ;;  %v2247_v24 = vsub.f32 %v2043_v27, %v227_v58 }
  0xe8   :  { %v188_v1 = vpop.xlane.xlu0 %187  ;;  %v190_v18 = vpop.xlane.xlu1 %189 }
  0xe9   :  { %v250_v22 = vmul.f32 0.0078125, %v188_v1  ;;  %v326_v59 = vmul.f32 %v2244_v53, %v2244_v53  ;;  %v251_v16 = vmul.f32 0.0078125, %v190_v18  ;;  %v327_v27 = vmul.f32 %v2247_v24, %v2247_v24 }
  0xeb   :  { %v2254_v8 = vsub.f32 %v2047_v28, %v250_v22  ;;  %436 = vadd.xlane.f32.xlu1 %v349_v25  ;;  %390 = vadd.xlane.f32.xlu0 %v326_v59  ;;  %v2257_v26 = vsub.f32 %v2049_v29, %v251_v16 }
  0xec   :  { %v144_v10 = vpop.xlane.xlu0 %143  ;;  %v146_v0 = vpop.xlane.xlu1 %145 }
  0xed   :  { %v228_v14 = vmul.f32 0.0078125, %v144_v10  ;;  %v350_v58 = vmul.f32 %v2254_v8, %v2254_v8  ;;  %v229_v1 = vmul.f32 0.0078125, %v146_v0  ;;  %v351_v29 = vmul.f32 %v2257_v26, %v2257_v26 }
  0xef   :  { %v2264_v18 = vsub.f32 %v2053_v30, %v228_v14  ;;  %392 = vadd.xlane.f32.xlu1 %v327_v27  ;;  %438 = vadd.xlane.f32.xlu0 %v350_v58  ;;  %v2267_v28 = vsub.f32 %v2055_v31, %v229_v1 }
  0xf0   :  { %v192_v25 = vpop.xlane.xlu0 %191  ;;  %v194_v22 = vpop.xlane.xlu1 %193 }
  0xf1   :  { %v252_v59 = vmul.f32 0.0078125, %v192_v25  ;;  %v328_v16 = vmul.f32 %v2264_v18, %v2264_v18  ;;  %v253_v10 = vmul.f32 0.0078125, %v194_v22  ;;  %v329_v31 = vmul.f32 %v2267_v28, %v2267_v28 }
  0xf3   :  { %v2274_v0 = vsub.f32 %v2059_v32, %v252_v59  ;;  %440 = vadd.xlane.f32.xlu1 %v351_v29  ;;  %394 = vadd.xlane.f32.xlu0 %v328_v16  ;;  %v2277_v30 = vsub.f32 %v2061_v33, %v253_v10 }
  0xf4   :  { %v148_v27 = vpop.xlane.xlu0 %147  ;;  %v150_v14 = vpop.xlane.xlu1 %149 }
  0xf5   :  { %v230_v58 = vmul.f32 0.0078125, %v148_v27  ;;  %v352_v1 = vmul.f32 %v2274_v0, %v2274_v0  ;;  %v231_v25 = vmul.f32 0.0078125, %v150_v14  ;;  %v353_v33 = vmul.f32 %v2277_v30, %v2277_v30 }
  0xf7   :  { %v2284_v22 = vsub.f32 %v2065_v34, %v230_v58  ;;  %396 = vadd.xlane.f32.xlu1 %v329_v31  ;;  %442 = vadd.xlane.f32.xlu0 %v352_v1  ;;  %v2287_v32 = vsub.f32 %v2067_v35, %v231_v25 }
  0xf8   :  { %v196_v29 = vpop.xlane.xlu0 %195  ;;  %v198_v59 = vpop.xlane.xlu1 %197 }
  0xf9   :  { %v254_v16 = vmul.f32 0.0078125, %v196_v29  ;;  %v330_v10 = vmul.f32 %v2284_v22, %v2284_v22  ;;  %v255_v27 = vmul.f32 0.0078125, %v198_v59  ;;  %v331_v35 = vmul.f32 %v2287_v32, %v2287_v32 }
  0xfb   :  { %v2294_v14 = vsub.f32 %v2071_v36, %v254_v16  ;;  %444 = vadd.xlane.f32.xlu1 %v353_v33  ;;  %398 = vadd.xlane.f32.xlu0 %v330_v10  ;;  %v2297_v34 = vsub.f32 %v2073_v37, %v255_v27 }
  0xfc   :  { %v152_v31 = vpop.xlane.xlu0 %151  ;;  %v154_v58 = vpop.xlane.xlu1 %153 }
  0xfd   :  { %v232_v1 = vmul.f32 0.0078125, %v152_v31  ;;  %v354_v25 = vmul.f32 %v2294_v14, %v2294_v14  ;;  %v233_v29 = vmul.f32 0.0078125, %v154_v58  ;;  %v355_v37 = vmul.f32 %v2297_v34, %v2297_v34 }
  0xff   :  { %v2304_v59 = vsub.f32 %v2077_v38, %v232_v1  ;;  %400 = vadd.xlane.f32.xlu1 %v331_v35  ;;  %446 = vadd.xlane.f32.xlu0 %v354_v25  ;;  %v2307_v36 = vsub.f32 %v2079_v39, %v233_v29 }
 0x100   :  { %v200_v33 = vpop.xlane.xlu0 %199  ;;  %v202_v16 = vpop.xlane.xlu1 %201 }
 0x101   :  { %v256_v10 = vmul.f32 0.0078125, %v200_v33  ;;  %v332_v27 = vmul.f32 %v2304_v59, %v2304_v59  ;;  %v257_v31 = vmul.f32 0.0078125, %v202_v16  ;;  %v333_v39 = vmul.f32 %v2307_v36, %v2307_v36 }
 0x103   :  { %v2314_v58 = vsub.f32 %v2083_v40, %v256_v10  ;;  %448 = vadd.xlane.f32.xlu1 %v355_v37  ;;  %402 = vadd.xlane.f32.xlu0 %v332_v27  ;;  %v2317_v38 = vsub.f32 %v2085_v41, %v257_v31 }
 0x104   :  { %v156_v35 = vpop.xlane.xlu0 %155  ;;  %v158_v1 = vpop.xlane.xlu1 %157 }
 0x105   :  { %v234_v25 = vmul.f32 0.0078125, %v156_v35  ;;  %v356_v29 = vmul.f32 %v2314_v58, %v2314_v58  ;;  %v235_v33 = vmul.f32 0.0078125, %v158_v1  ;;  %v357_v41 = vmul.f32 %v2317_v38, %v2317_v38 }
 0x107   :  { %v2324_v16 = vsub.f32 %v2089_v42, %v234_v25  ;;  %404 = vadd.xlane.f32.xlu1 %v333_v39  ;;  %450 = vadd.xlane.f32.xlu0 %v356_v29  ;;  %v2327_v40 = vsub.f32 %v2091_v43, %v235_v33 }
 0x108   :  { %v204_v37 = vpop.xlane.xlu0 %203  ;;  %v206_v10 = vpop.xlane.xlu1 %205 }
 0x109   :  { %v258_v27 = vmul.f32 0.0078125, %v204_v37  ;;  %v334_v31 = vmul.f32 %v2324_v16, %v2324_v16  ;;  %v259_v35 = vmul.f32 0.0078125, %v206_v10  ;;  %v335_v43 = vmul.f32 %v2327_v40, %v2327_v40 }
 0x10b   :  { %v2334_v1 = vsub.f32 %v2095_v44, %v258_v27  ;;  %452 = vadd.xlane.f32.xlu1 %v357_v41  ;;  %406 = vadd.xlane.f32.xlu0 %v334_v31  ;;  %v2337_v42 = vsub.f32 %v2097_v45, %v259_v35 }
 0x10c   :  { %v160_v39 = vpop.xlane.xlu0 %159  ;;  %v162_v25 = vpop.xlane.xlu1 %161 }
 0x10d   :  { %2672 = vst [vmem:[#allocation12_spill] sm:$0xff] %v2334_v1  ;;  %2673 = vst [vmem:[#allocation13_spill] sm:$0xff] %v2337_v42  ;;  %v236_v29 = vmul.f32 0.0078125, %v160_v39  ;;  %v358_v33 = vmul.f32 %v2334_v1, %v2334_v1  ;;  %v237_v37 = vmul.f32 0.0078125, %v162_v25  ;;  %v359_v45 = vmul.f32 %v2337_v42, %v2337_v42 }
 0x10f   :  { %v2344_v10 = vsub.f32 %v2101_v46, %v236_v29  ;;  %408 = vadd.xlane.f32.xlu1 %v335_v43  ;;  %454 = vadd.xlane.f32.xlu0 %v358_v33  ;;  %v2347_v44 = vsub.f32 %v2103_v47, %v237_v37 }
 0x110   :  { %v208_v41 = vpop.xlane.xlu0 %207  ;;  %v210_v27 = vpop.xlane.xlu1 %209 }
 0x111   :  { %2674 = vst [vmem:[#allocation14_spill] sm:$0xff] %v2344_v10  ;;  %2675 = vst [vmem:[#allocation15_spill] sm:$0xff] %v2347_v44  ;;  %v260_v31 = vmul.f32 0.0078125, %v208_v41  ;;  %v336_v35 = vmul.f32 %v2344_v10, %v2344_v10  ;;  %v261_v39 = vmul.f32 0.0078125, %v210_v27  ;;  %v337_v47 = vmul.f32 %v2347_v44, %v2347_v44 }
 0x113   :  { %v2354_v25 = vsub.f32 %v2107_v48, %v260_v31  ;;  %456 = vadd.xlane.f32.xlu1 %v359_v45  ;;  %410 = vadd.xlane.f32.xlu0 %v336_v35  ;;  %v2357_v46 = vsub.f32 %v2109_v49, %v261_v39 }
 0x115   :  { %2676 = vst [vmem:[#allocation16_spill] sm:$0xff] %v2354_v25  ;;  %2677 = vst [vmem:[#allocation17_spill] sm:$0xff] %v2357_v46  ;;  %v360_v43 = vmul.f32 %v2354_v25, %v2354_v25  ;;  %v361_v29 = vmul.f32 %v2357_v46, %v2357_v46 }
 0x117   :  { %412 = vadd.xlane.f32.xlu1 %v337_v47  ;;  %458 = vadd.xlane.f32.xlu0 %v360_v43 }
 0x11b   :  { %460 = vadd.xlane.f32.xlu1 %v361_v29 }
 0x140   :  { %v363_v33 = vpop.xlane.xlu0 %362 }
 0x141   :  { %v462_v48 = vmul.f32 0.0078125, %v363_v33 }
 0x143   :  { %v512_v37 = vadd.f32 1e-05, %v462_v48 }
 0x144   :  { %v365_v45 = vpop.xlane.xlu1 %364  ;;  %v367_v41 = vpop.xlane.xlu0 %366 }
 0x145   :  { %1725 = vrsqrt.f32 %v512_v37  ;;  %v463_v49 = vmul.f32 0.0078125, %v365_v45  ;;  %v464_v27 = vmul.f32 0.0078125, %v367_v41 }
 0x147   :  { %v513_v31 = vadd.f32 1e-05, %v463_v49  ;;  %v514_v35 = vadd.f32 1e-05, %v464_v27 }
 0x148   :  { %v369_v39 = vpop.xlane.xlu1 %368  ;;  %v415_v12 = vpop.xlane.xlu0 %414 }
 0x149   :  { %1727 = vrsqrt.f32 %v513_v31  ;;  %v465_v25 = vmul.f32 0.0078125, %v369_v39  ;;  %v488_v47 = vmul.f32 0.0078125, %v415_v12 }
 0x14a   :  { %1729 = vrsqrt.f32 %v514_v35  ;;  %v2369_v35 = vld [vmem:[%s2659_s1] ss:$0 sm:$0xff] }
 0x14b   :  { %v515_v43 = vadd.f32 1e-05, %v465_v25  ;;  %v538_v44 = vadd.f32 1e-05, %v488_v47 }
 0x14c   :  { %v417_v46 = vpop.xlane.xlu1 %416  ;;  %v371_v29 = vpop.xlane.xlu0 %370 }
 0x14d   :  { %1731 = vrsqrt.f32 %v515_v43  ;;  %v489_v33 = vmul.f32 0.0078125, %v417_v46  ;;  %v466_v48 = vmul.f32 0.0078125, %v371_v29 }
 0x14e   :  { %1733 = vrsqrt.f32 %v538_v44 }
 0x14f   :  { %v539_v10 = vadd.f32 1e-05, %v489_v33  ;;  %v516_v37 = vadd.f32 1e-05, %v466_v48 }
 0x150   :  { %v373_v45 = vpop.xlane.xlu1 %372  ;;  %v419_v41 = vpop.xlane.xlu0 %418 }
 0x151   :  { %1735 = vrsqrt.f32 %v539_v10  ;;  %v467_v49 = vmul.f32 0.0078125, %v373_v45  ;;  %v490_v27 = vmul.f32 0.0078125, %v419_v41 }
 0x152   :  { %v1726_v42 = vpop.eup %1725  ;;  %1737 = vrsqrt.f32 %v516_v37 }
 0x153   :  { %v517_v31 = vadd.f32 1e-05, %v467_v49  ;;  %v540_v12 = vadd.f32 1e-05, %v490_v27  ;;  %v612_v25 = vmul.f32 %v1726_v42, %v2114_v56  ;;  %v2373_v56 = vld [vmem:[#allocation5] ss:$0 sm:$0xff] }
 0x154   :  { %v421_v46 = vpop.xlane.xlu1 %420  ;;  %v375_v44 = vpop.xlane.xlu0 %374 }
 0x155   :  { %1739 = vrsqrt.f32 %v517_v31  ;;  %v491_v39 = vmul.f32 0.0078125, %v421_v46  ;;  %v468_v47 = vmul.f32 0.0078125, %v375_v44  ;;  %v669_v10 = vmul.f32 %v2369_v35, %v612_v25 }
 0x156   :  { %v1728_v43 = vpop.eup %1727  ;;  %1741 = vrsqrt.f32 %v540_v12 }
 0x157   :  { %v1730_v29 = vpop.eup %1729  ;;  %v541_v33 = vadd.f32 1e-05, %v491_v39  ;;  %v518_v48 = vadd.f32 1e-05, %v468_v47  ;;  %v613_v37 = vmul.f32 %v1728_v43, %v2122_v63  ;;  %v726_v12 = vadd.f32 %v2373_v56, %v669_v10 }
 0x158   :  { %v377_v42 = vpop.xlane.xlu1 %376  ;;  %v423_v45 = vpop.xlane.xlu0 %422  ;;  %v614_v25 = vmul.f32 %v1730_v29, %v2117_v57 }
 0x159   :  { %1743 = vrsqrt.f32 %v541_v33  ;;  %v469_v41 = vmul.f32 0.0078125, %v377_v42  ;;  %v492_v49 = vmul.f32 0.0078125, %v423_v45  ;;  %v670_v27 = vmul.f32 %v2369_v35, %v613_v37 }
 0x15a   :  { %v1732_v31 = vpop.eup %1731  ;;  %1745 = vrsqrt.f32 %v518_v48  ;;  %v671_v10 = vmul.f32 %v2369_v35, %v614_v25 }
 0x15b   :  { %v1734_v46 = vpop.eup %1733  ;;  %v519_v44 = vadd.f32 1e-05, %v469_v41  ;;  %v542_v39 = vadd.f32 1e-05, %v492_v49  ;;  %v727_v63 = vadd.f32 %v2373_v56, %v670_v27  ;;  %v615_v47 = vmul.f32 %v1732_v31, %v2125_v50 }
 0x15c   :  { %v425_v43 = vpop.xlane.xlu1 %424  ;;  %v379_v1 = vpop.xlane.xlu0 %378  ;;  %v638_v33 = vmul.f32 %v1734_v46, %v2132_v55  ;;  %v2678_v46 = vmov 0  }
 0x15d   :  { %1747 = vrsqrt.f32 %v519_v44  ;;  %v493_v42 = vmul.f32 0.0078125, %v425_v43  ;;  %v470_v37 = vmul.f32 0.0078125, %v379_v1  ;;  %v776_v45 = vpack.c.bf16 %v727_v63, %v726_v12 }
 0x15e   :  { %v1736_v48 = vpop.eup %1735  ;;  %1749 = vrsqrt.f32 %v542_v39  ;;  %v672_v57 = vmul.f32 %v2369_v35, %v615_v47  ;;  %v695_v29 = vmul.f32 %v2369_v35, %v638_v33  ;;  %v728_v63 = vadd.f32 %v2373_v56, %v671_v10 }
 0x15f   :  { %v1738_v41 = vpop.eup %1737  ;;  %v543_v49 = vadd.f32 1e-05, %v493_v42  ;;  %v520_v27 = vadd.f32 1e-05, %v470_v37  ;;  %942 = vmatmul.mubr.bf16.vlgmr.msra.gmra.mxu0 %v776_v45  ;;  %v639_v50 = vmul.f32 %v1736_v48, %v2135_v2 }
 0x160   :  { %v381_v31 = vpop.xlane.xlu1 %380  ;;  %v427_v55 = vpop.xlane.xlu0 %426  ;;  %951 = vmatprep.mubr.bf16.mxu0 %v2678_v46  ;;  %v729_v1 = vadd.f32 %v2373_v56, %v672_v57  ;;  %v752_v47 = vadd.f32 %v2373_v56, %v695_v29  ;;  %v616_v43 = vmul.f32 %v1738_v41, %v2142_v51 }
 0x161   :  { %1751 = vrsqrt.f32 %v543_v49  ;;  %v471_v12 = vmul.f32 0.0078125, %v381_v31  ;;  %v494_v44 = vmul.f32 0.0078125, %v427_v55  ;;  %v696_v25 = vmul.f32 %v2369_v35, %v639_v50 }
 0x162   :  { %v1740_v39 = vpop.eup %1739  ;;  %1753 = vrsqrt.f32 %v520_v27  ;;  %v777_v49 = vpack.c.bf16 %v729_v1, %v728_v63  ;;  %v673_v51 = vmul.f32 %v2369_v35, %v616_v43 }
 0x163   :  { %v1742_v2 = vpop.eup %1741  ;;  %v521_v33 = vadd.f32 1e-05, %v471_v12  ;;  %v544_v42 = vadd.f32 1e-05, %v494_v44  ;;  %v753_v37 = vadd.f32 %v2373_v56, %v696_v25  ;;  %v617_v45 = vmul.f32 %v1740_v39, %v2145_v4 }
 0x164   :  { %v429_v48 = vpop.xlane.xlu1 %428  ;;  %v383_v57 = vpop.xlane.xlu0 %382  ;;  %v640_v50 = vmul.f32 %v1742_v2, %v2152_v6 }
 0x165   :  { %1755 = vrsqrt.f32 %v521_v33  ;;  %v495_v27 = vmul.f32 0.0078125, %v429_v48  ;;  %v472_v31 = vmul.f32 0.0078125, %v383_v57  ;;  %v789_v10 = vpack.c.bf16 %v753_v37, %v752_v47 }
 0x166   :  { %v1744_v55 = vpop.eup %1743  ;;  %1757 = vrsqrt.f32 %v544_v42  ;;  %v674_v29 = vmul.f32 %v2369_v35, %v617_v45  ;;  %v697_v41 = vmul.f32 %v2369_v35, %v640_v50  ;;  %v730_v33 = vadd.f32 %v2373_v56, %v673_v51 }
 0x167   :  { %v1746_v12 = vpop.eup %1745  ;;  %v545_v44 = vadd.f32 1e-05, %v495_v27  ;;  %v522_v4 = vadd.f32 1e-05, %v472_v31  ;;  %952 = vmatmul.mubr.bf16.gmra.mxu0 %v777_v49  ;;  %1072 = vmatmul.mubr.bf16.vlgmr.msra.gmra.mxu1 %v789_v10  ;;  %v641_v1 = vmul.f32 %v1744_v55, %v2155_v7 }
 0x168   :  { %v385_v6 = vpop.xlane.xlu1 %384  ;;  %v431_v25 = vpop.xlane.xlu0 %430  ;;  %961 = vmatprep.mubr.bf16.mxu0 %v2678_v46  ;;  %1081 = vmatprep.mubr.bf16.mxu1 %v2678_v46  ;;  %v731_v39 = vadd.f32 %v2373_v56, %v674_v29  ;;  %v754_v42 = vadd.f32 %v2373_v56, %v697_v41  ;;  %v618_v7 = vmul.f32 %v1746_v12, %v2162_v5 }
 0x169   :  { %1759 = vrsqrt.f32 %v545_v44  ;;  %v473_v63 = vmul.f32 0.0078125, %v385_v6  ;;  %v496_v47 = vmul.f32 0.0078125, %v431_v25  ;;  %v698_v43 = vmul.f32 %v2369_v35, %v641_v1 }
 0x16a   :  { %v1748_v2 = vpop.eup %1747  ;;  %1761 = vrsqrt.f32 %v522_v4  ;;  %v778_v31 = vpack.c.bf16 %v731_v39, %v730_v33  ;;  %v675_v5 = vmul.f32 %v2369_v35, %v618_v7 }
 0x16b   :  { %v1750_v37 = vpop.eup %1749  ;;  %v523_v45 = vadd.f32 1e-05, %v473_v63  ;;  %v546_v48 = vadd.f32 1e-05, %v496_v47  ;;  %v755_v57 = vadd.f32 %v2373_v56, %v698_v43  ;;  %v619_v49 = vmul.f32 %v1748_v2, %v2165_v9 }
 0x16c   :  { %v433_v50 = vpop.xlane.xlu1 %432  ;;  %v387_v27 = vpop.xlane.xlu0 %386  ;;  %v642_v10 = vmul.f32 %v1750_v37, %v2172_v3  ;;  %v732_v33 = vadd.f32 %v2373_v56, %v675_v5 }
 0x16d   :  { %1763 = vrsqrt.f32 %v523_v45  ;;  %v497_v55 = vmul.f32 0.0078125, %v433_v50  ;;  %v474_v29 = vmul.f32 0.0078125, %v387_v27  ;;  %v790_v51 = vpack.c.bf16 %v755_v57, %v754_v42 }
 0x16e   :  { %v1752_v44 = vpop.eup %1751  ;;  %1765 = vrsqrt.f32 %v546_v48  ;;  %v676_v41 = vmul.f32 %v2369_v35, %v619_v49  ;;  %v699_v12 = vmul.f32 %v2369_v35, %v642_v10 }
 0x16f   :  { %v1754_v4 = vpop.eup %1753  ;;  %v547_v1 = vadd.f32 1e-05, %v497_v55  ;;  %v524_v9 = vadd.f32 1e-05, %v474_v29  ;;  %962 = vmatmul.mubr.bf16.gmra.mxu0 %v778_v31  ;;  %1082 = vmatmul.mubr.bf16.gmra.mxu1 %v790_v51  ;;  %v643_v6 = vmul.f32 %v1752_v44, %v2175_v11 }
 0x170   :  { %v389_v3 = vpop.xlane.xlu1 %388  ;;  %v435_v25 = vpop.xlane.xlu0 %434  ;;  %971 = vmatprep.mubr.bf16.mxu0 %v2678_v46  ;;  %1091 = vmatprep.mubr.bf16.mxu1 %v2678_v46  ;;  %v733_v39 = vadd.f32 %v2373_v56, %v676_v41  ;;  %v756_v42 = vadd.f32 %v2373_v56, %v699_v12  ;;  %v620_v11 = vmul.f32 %v1754_v4, %v2182_v52 }
 0x171   :  { %1767 = vrsqrt.f32 %v547_v1  ;;  %v475_v63 = vmul.f32 0.0078125, %v389_v3  ;;  %v498_v47 = vmul.f32 0.0078125, %v435_v25  ;;  %v700_v43 = vmul.f32 %v2369_v35, %v643_v6 }
 0x172   :  { %v1756_v2 = vpop.eup %1755  ;;  %1769 = vrsqrt.f32 %v524_v9  ;;  %v779_v27 = vpack.c.bf16 %v733_v39, %v732_v33  ;;  %v677_v52 = vmul.f32 %v2369_v35, %v620_v11 }
 0x173   :  { %v1758_v7 = vpop.eup %1757  ;;  %v525_v37 = vadd.f32 1e-05, %v475_v63  ;;  %v548_v45 = vadd.f32 1e-05, %v498_v47  ;;  %v757_v48 = vadd.f32 %v2373_v56, %v700_v43  ;;  %v621_v57 = vmul.f32 %v1756_v2, %v2185_v13 }
 0x174   :  { %v437_v49 = vpop.xlane.xlu1 %436  ;;  %v391_v50 = vpop.xlane.xlu0 %390  ;;  %v644_v31 = vmul.f32 %v1758_v7, %v2192_v62  ;;  %v734_v63 = vadd.f32 %v2373_v56, %v677_v52 }
 0x175   :  { %1771 = vrsqrt.f32 %v525_v37  ;;  %v499_v10 = vmul.f32 0.0078125, %v437_v49  ;;  %v476_v55 = vmul.f32 0.0078125, %v391_v50  ;;  %v791_v29 = vpack.c.bf16 %v757_v48, %v756_v42 }
 0x176   :  { %v1760_v51 = vpop.eup %1759  ;;  %1773 = vrsqrt.f32 %v548_v45  ;;  %v678_v44 = vmul.f32 %v2369_v35, %v621_v57  ;;  %v701_v5 = vmul.f32 %v2369_v35, %v644_v31 }
 0x177   :  { %v1762_v41 = vpop.eup %1761  ;;  %v549_v12 = vadd.f32 1e-05, %v499_v10  ;;  %v526_v13 = vadd.f32 1e-05, %v476_v55  ;;  %972 = vmatmul.mubr.bf16.gmra.mxu0 %v779_v27  ;;  %1092 = vmatmul.mubr.bf16.gmra.mxu1 %v791_v29  ;;  %v645_v4 = vmul.f32 %v1760_v51, %v2195_v15 }
 0x178   :  { %v393_v62 = vpop.xlane.xlu1 %392  ;;  %v439_v1 = vpop.xlane.xlu0 %438  ;;  %981 = vmatprep.mubr.bf16.mxu0 %v2678_v46  ;;  %1101 = vmatprep.mubr.bf16.mxu1 %v2678_v46  ;;  %v735_v9 = vadd.f32 %v2373_v56, %v678_v44  ;;  %v758_v47 = vadd.f32 %v2373_v56, %v701_v5  ;;  %v622_v15 = vmul.f32 %v1762_v41, %v2202_v60 }
 0x179   :  { %1775 = vrsqrt.f32 %v549_v12  ;;  %v477_v6 = vmul.f32 0.0078125, %v393_v62  ;;  %v500_v3 = vmul.f32 0.0078125, %v439_v1  ;;  %v702_v25 = vmul.f32 %v2369_v35, %v645_v4 }
 0x17a   :  { %v1764_v39 = vpop.eup %1763  ;;  %1777 = vrsqrt.f32 %v526_v13  ;;  %v780_v45 = vpack.c.bf16 %v735_v9, %v734_v63  ;;  %v679_v60 = vmul.f32 %v2369_v35, %v622_v15 }
 0x17b   :  { %v1766_v43 = vpop.eup %1765  ;;  %v527_v2 = vadd.f32 1e-05, %v477_v6  ;;  %v550_v33 = vadd.f32 1e-05, %v500_v3  ;;  %v759_v42 = vadd.f32 %v2373_v56, %v702_v25  ;;  %v623_v11 = vmul.f32 %v1764_v39, %v2205_v17 }
 0x17c   :  { %v441_v7 = vpop.xlane.xlu1 %440  ;;  %v395_v37 = vpop.xlane.xlu0 %394  ;;  %v646_v48 = vmul.f32 %v1766_v43, %v2212_v54  ;;  %v736_v4 = vadd.f32 %v2373_v56, %v679_v60 }
 0x17d   :  { %1779 = vrsqrt.f32 %v527_v2  ;;  %v501_v57 = vmul.f32 0.0078125, %v441_v7  ;;  %v478_v49 = vmul.f32 0.0078125, %v395_v37  ;;  %v792_v50 = vpack.c.bf16 %v759_v42, %v758_v47 }
 0x17e   :  { %v1768_v27 = vpop.eup %1767  ;;  %1781 = vrsqrt.f32 %v550_v33  ;;  %v680_v31 = vmul.f32 %v2369_v35, %v623_v11  ;;  %v703_v10 = vmul.f32 %v2369_v35, %v646_v48 }
 0x17f   :  { %v1770_v55 = vpop.eup %1769  ;;  %v551_v29 = vadd.f32 1e-05, %v501_v57  ;;  %v528_v17 = vadd.f32 1e-05, %v478_v49  ;;  %982 = vmatmul.mubr.bf16.gmra.mxu0 %v780_v45  ;;  %1102 = vmatmul.mubr.bf16.gmra.mxu1 %v792_v50  ;;  %v647_v51 = vmul.f32 %v1768_v27, %v2215_v19 }
 0x180   :  { %v397_v54 = vpop.xlane.xlu1 %396  ;;  %v443_v52 = vpop.xlane.xlu0 %442  ;;  %991 = vmatprep.mubr.bf16.mxu0 %v2678_v46  ;;  %1111 = vmatprep.mubr.bf16.mxu1 %v2678_v46  ;;  %v737_v44 = vadd.f32 %v2373_v56, %v680_v31  ;;  %v760_v62 = vadd.f32 %v2373_v56, %v703_v10  ;;  %v624_v19 = vmul.f32 %v1770_v55, %v2222_v20 }
 0x181   :  { %1783 = vrsqrt.f32 %v551_v29  ;;  %v479_v5 = vmul.f32 0.0078125, %v397_v54  ;;  %v502_v41 = vmul.f32 0.0078125, %v443_v52  ;;  %v704_v12 = vmul.f32 %v2369_v35, %v647_v51 }
 0x182   :  { %v1772_v13 = vpop.eup %1771  ;;  %1785 = vrsqrt.f32 %v528_v17  ;;  %v781_v47 = vpack.c.bf16 %v737_v44, %v736_v4  ;;  %v681_v20 = vmul.f32 %v2369_v35, %v624_v19 }
 0x183   :  { %v1774_v1 = vpop.eup %1773  ;;  %v529_v9 = vadd.f32 1e-05, %v479_v5  ;;  %v552_v6 = vadd.f32 1e-05, %v502_v41  ;;  %v761_v3 = vadd.f32 %v2373_v56, %v704_v12  ;;  %v625_v25 = vmul.f32 %v1772_v13, %v2225_v21 }
 0x184   :  { %v445_v39 = vpop.xlane.xlu1 %444  ;;  %v399_v63 = vpop.xlane.xlu0 %398  ;;  %v648_v15 = vmul.f32 %v1774_v1, %v2234_v61  ;;  %v738_v10 = vadd.f32 %v2373_v56, %v681_v20 }
 0x185   :  { %1787 = vrsqrt.f32 %v529_v9  ;;  %v503_v43 = vmul.f32 0.0078125, %v445_v39  ;;  %v480_v2 = vmul.f32 0.0078125, %v399_v63  ;;  %v793_v33 = vpack.c.bf16 %v761_v3, %v760_v62 }
 0x186   :  { %v1776_v42 = vpop.eup %1775  ;;  %1789 = vrsqrt.f32 %v552_v6  ;;  %v682_v11 = vmul.f32 %v2369_v35, %v625_v25  ;;  %v705_v7 = vmul.f32 %v2369_v35, %v648_v15 }
 0x187   :  { %v1778_v37 = vpop.eup %1777  ;;  %v553_v45 = vadd.f32 1e-05, %v503_v43  ;;  %v530_v21 = vadd.f32 1e-05, %v480_v2  ;;  %992 = vmatmul.mubr.bf16.gmra.mxu0 %v781_v47  ;;  %1112 = vmatmul.mubr.bf16.gmra.mxu1 %v793_v33  ;;  %v649_v48 = vmul.f32 %v1776_v42, %v2237_v23 }
 0x188   :  { %v401_v61 = vpop.xlane.xlu1 %400  ;;  %v447_v57 = vpop.xlane.xlu0 %446  ;;  %1001 = vmatprep.mubr.bf16.mxu0 %v2678_v46  ;;  %1121 = vmatprep.mubr.bf16.mxu1 %v2678_v46  ;;  %v739_v49 = vadd.f32 %v2373_v56, %v682_v11  ;;  %v762_v55 = vadd.f32 %v2373_v56, %v705_v7  ;;  %v626_v23 = vmul.f32 %v1778_v37, %v2244_v53 }
 0x189   :  { %1791 = vrsqrt.f32 %v553_v45  ;;  %v481_v50 = vmul.f32 0.0078125, %v401_v61  ;;  %v504_v27 = vmul.f32 0.0078125, %v447_v57  ;;  %v706_v60 = vmul.f32 %v2369_v35, %v649_v48 }
 0x18a   :  { %v1780_v31 = vpop.eup %1779  ;;  %1793 = vrsqrt.f32 %v530_v21  ;;  %v782_v41 = vpack.c.bf16 %v739_v49, %v738_v10  ;;  %v683_v53 = vmul.f32 %v2369_v35, %v626_v23 }
 0x18b   :  { %v1782_v29 = vpop.eup %1781  ;;  %v531_v17 = vadd.f32 1e-05, %v481_v50  ;;  %v554_v51 = vadd.f32 1e-05, %v504_v27  ;;  %v763_v54 = vadd.f32 %v2373_v56, %v706_v60  ;;  %v627_v52 = vmul.f32 %v1780_v31, %v2247_v24 }
 0x18c   :  { %v449_v44 = vpop.xlane.xlu1 %448  ;;  %v403_v5 = vpop.xlane.xlu0 %402  ;;  %v650_v12 = vmul.f32 %v1782_v29, %v2254_v8  ;;  %v740_v33 = vadd.f32 %v2373_v56, %v683_v53 }
 0x18d   :  { %1795 = vrsqrt.f32 %v531_v17  ;;  %v505_v13 = vmul.f32 0.0078125, %v449_v44  ;;  %v482_v4 = vmul.f32 0.0078125, %v403_v5  ;;  %v794_v62 = vpack.c.bf16 %v763_v54, %v762_v55 }
 0x18e   :  { %v1784_v19 = vpop.eup %1783  ;;  %1797 = vrsqrt.f32 %v554_v51  ;;  %v684_v1 = vmul.f32 %v2369_v35, %v627_v52  ;;  %v707_v9 = vmul.f32 %v2369_v35, %v650_v12 }
 0x18f   :  { %v1786_v6 = vpop.eup %1785  ;;  %v555_v3 = vadd.f32 1e-05, %v505_v13  ;;  %v532_v24 = vadd.f32 1e-05, %v482_v4  ;;  %1002 = vmatmul.mubr.bf16.gmra.mxu0 %v782_v41  ;;  %1122 = vmatmul.mubr.bf16.gmra.mxu1 %v794_v62  ;;  %v651_v25 = vmul.f32 %v1784_v19, %v2257_v26 }
 0x190   :  { %v405_v8 = vpop.xlane.xlu1 %404  ;;  %v451_v39 = vpop.xlane.xlu0 %450  ;;  %1011 = vmatprep.mubr.bf16.mxu0 %v2678_v46  ;;  %1131 = vmatprep.mubr.bf16.mxu1 %v2678_v46  ;;  %v741_v63 = vadd.f32 %v2373_v56, %v684_v1  ;;  %v764_v42 = vadd.f32 %v2373_v56, %v707_v9  ;;  %v628_v26 = vmul.f32 %v1786_v6, %v2264_v18 }
 0x191   :  { %1799 = vrsqrt.f32 %v555_v3  ;;  %v483_v47 = vmul.f32 0.0078125, %v405_v8  ;;  %v506_v15 = vmul.f32 0.0078125, %v451_v39  ;;  %v708_v43 = vmul.f32 %v2369_v35, %v651_v25 }
 0x192   :  { %v1788_v2 = vpop.eup %1787  ;;  %1801 = vrsqrt.f32 %v532_v24  ;;  %v783_v61 = vpack.c.bf16 %v741_v63, %v740_v33  ;;  %v685_v18 = vmul.f32 %v2369_v35, %v628_v26 }
 0x193   :  { %v1790_v20 = vpop.eup %1789  ;;  %v533_v11 = vadd.f32 1e-05, %v483_v47  ;;  %v556_v7 = vadd.f32 1e-05, %v506_v15  ;;  %v765_v37 = vadd.f32 %v2373_v56, %v708_v43  ;;  %v629_v45 = vmul.f32 %v1788_v2, %v2267_v28 }
 0x194   :  { %v453_v21 = vpop.xlane.xlu1 %452  ;;  %v407_v48 = vpop.xlane.xlu0 %406  ;;  %v652_v57 = vmul.f32 %v1790_v20, %v2274_v0  ;;  %v742_v41 = vadd.f32 %v2373_v56, %v685_v18 }
 0x195   :  { %1803 = vrsqrt.f32 %v533_v11  ;;  %v507_v49 = vmul.f32 0.0078125, %v453_v21  ;;  %v484_v50 = vmul.f32 0.0078125, %v407_v48  ;;  %v795_v27 = vpack.c.bf16 %v765_v37, %v764_v42 }
 0x196   :  { %v1792_v60 = vpop.eup %1791  ;;  %1805 = vrsqrt.f32 %v556_v7  ;;  %v686_v31 = vmul.f32 %v2369_v35, %v629_v45  ;;  %v709_v10 = vmul.f32 %v2369_v35, %v652_v57 }
 0x197   :  { %v1794_v55 = vpop.eup %1793  ;;  %v557_v23 = vadd.f32 1e-05, %v507_v49  ;;  %v534_v28 = vadd.f32 1e-05, %v484_v50  ;;  %1012 = vmatmul.mubr.bf16.gmra.mxu0 %v783_v61  ;;  %1132 = vmatmul.mubr.bf16.gmra.mxu1 %v795_v27  ;;  %v653_v29 = vmul.f32 %v1792_v60, %v2277_v30 }
 0x198   :  { %v409_v0 = vpop.xlane.xlu1 %408  ;;  %v455_v17 = vpop.xlane.xlu0 %454  ;;  %1021 = vmatprep.mubr.bf16.mxu0 %v2678_v46  ;;  %1141 = vmatprep.mubr.bf16.mxu1 %v2678_v46  ;;  %v743_v51 = vadd.f32 %v2373_v56, %v686_v31  ;;  %v766_v12 = vadd.f32 %v2373_v56, %v709_v10  ;;  %v630_v30 = vmul.f32 %v1794_v55, %v2284_v22 }
 0x199   :  { %1807 = vrsqrt.f32 %v557_v23  ;;  %v485_v54 = vmul.f32 0.0078125, %v409_v0  ;;  %v508_v52 = vmul.f32 0.0078125, %v455_v17  ;;  %v710_v44 = vmul.f32 %v2369_v35, %v653_v29 }
 0x19a   :  { %v1796_v5 = vpop.eup %1795  ;;  %1809 = vrsqrt.f32 %v534_v28  ;;  %v784_v6 = vpack.c.bf16 %v743_v51, %v742_v41  ;;  %v687_v22 = vmul.f32 %v2369_v35, %v630_v30  ;;  %v2679_v41 = vld [vmem:[#allocation12_spill] sm:$0xff] }
 0x19b   :  { %v1798_v13 = vpop.eup %1797  ;;  %v535_v4 = vadd.f32 1e-05, %v485_v54  ;;  %v558_v62 = vadd.f32 1e-05, %v508_v52  ;;  %v767_v19 = vadd.f32 %v2373_v56, %v710_v44  ;;  %v631_v53 = vmul.f32 %v1796_v5, %v2287_v32 }
 0x19c   :  { %v457_v1 = vpop.xlane.xlu1 %456  ;;  %v411_v9 = vpop.xlane.xlu0 %410  ;;  %v654_v3 = vmul.f32 %v1798_v13, %v2294_v14  ;;  %v744_v37 = vadd.f32 %v2373_v56, %v687_v22  ;;  %v2681_v22 = vld [vmem:[#allocation14_spill] sm:$0xff] }
 0x19d   :  { %1811 = vrsqrt.f32 %v535_v4  ;;  %v509_v24 = vmul.f32 0.0078125, %v457_v1  ;;  %v486_v25 = vmul.f32 0.0078125, %v411_v9  ;;  %v796_v8 = vpack.c.bf16 %v767_v19, %v766_v12 }
 0x19e   :  { %v1800_v39 = vpop.eup %1799  ;;  %1813 = vrsqrt.f32 %v558_v62  ;;  %v688_v63 = vmul.f32 %v2369_v35, %v631_v53  ;;  %v711_v47 = vmul.f32 %v2369_v35, %v654_v3 }
 0x19f   :  { %v1802_v15 = vpop.eup %1801  ;;  %v559_v43 = vadd.f32 1e-05, %v509_v24  ;;  %v536_v32 = vadd.f32 1e-05, %v486_v25  ;;  %1022 = vmatmul.mubr.bf16.gmra.mxu0 %v784_v6  ;;  %1142 = vmatmul.mubr.bf16.gmra.mxu1 %v796_v8  ;;  %v655_v2 = vmul.f32 %v1800_v39, %v2297_v34 }
 0x1a0   :  { %v413_v14 = vpop.xlane.xlu1 %412  ;;  %v459_v33 = vpop.xlane.xlu0 %458  ;;  %1031 = vmatprep.mubr.bf16.mxu0 %v2678_v46  ;;  %1151 = vmatprep.mubr.bf16.mxu1 %v2678_v46  ;;  %v745_v42 = vadd.f32 %v2373_v56, %v688_v63  ;;  %v768_v45 = vadd.f32 %v2373_v56, %v711_v47  ;;  %v632_v34 = vmul.f32 %v1802_v15, %v2304_v59  ;;  %v2682_v47 = vld [vmem:[#allocation15_spill] sm:$0xff] }
 0x1a1   :  { %1815 = vrsqrt.f32 %v559_v43  ;;  %v487_v26 = vmul.f32 0.0078125, %v413_v14  ;;  %v510_v20 = vmul.f32 0.0078125, %v459_v33  ;;  %v712_v11 = vmul.f32 %v2369_v35, %v655_v2  ;;  %v2683_v43 = vld [vmem:[#allocation16_spill] sm:$0xff] }
 0x1a2   :  { %v1804_v7 = vpop.eup %1803  ;;  %1817 = vrsqrt.f32 %v536_v32  ;;  %v785_v27 = vpack.c.bf16 %v745_v42, %v744_v37  ;;  %v689_v28 = vmul.f32 %v2369_v35, %v632_v34 }
 0x1a3   :  { %v1806_v21 = vpop.eup %1805  ;;  %v537_v48 = vadd.f32 1e-05, %v487_v26  ;;  %v560_v61 = vadd.f32 1e-05, %v510_v20  ;;  %v769_v57 = vadd.f32 %v2373_v56, %v712_v11  ;;  %v633_v49 = vmul.f32 %v1804_v7, %v2307_v36  ;;  %v2684_v20 = vld [vmem:[#allocation17_spill] sm:$0xff] }
 0x1a4   :  { %v461_v50 = vpop.xlane.xlu1 %460  ;;  %v656_v60 = vmul.f32 %v1806_v21, %v2314_v58  ;;  %v746_v52 = vadd.f32 %v2373_v56, %v689_v28 }
 0x1a5   :  { %1819 = vrsqrt.f32 %v537_v48  ;;  %v511_v18 = vmul.f32 0.0078125, %v461_v50  ;;  %v797_v31 = vpack.c.bf16 %v769_v57, %v768_v45  ;;  %v690_v10 = vmul.f32 %v2369_v35, %v633_v49 }
 0x1a6   :  { %v1808_v55 = vpop.eup %1807  ;;  %1821 = vrsqrt.f32 %v560_v61  ;;  %v713_v36 = vmul.f32 %v2369_v35, %v656_v60  ;;  %v819_v49 = vlaneseq }
 0x1a7   :  { %v1810_v23 = vpop.eup %1809  ;;  %v561_v59 = vadd.f32 1e-05, %v511_v18  ;;  %1032 = vmatmul.mubr.bf16.gmra.mxu0 %v785_v27  ;;  %1152 = vmatmul.mubr.bf16.gmra.mxu1 %v797_v31  ;;  %v657_v29 = vmul.f32 %v1808_v55, %v2317_v38  ;;  %v747_v58 = vadd.f32 %v2373_v56, %v690_v10 }
 0x1a8   :  { %1041 = vmatprep.mubr.bf16.mxu0 %v2678_v46  ;;  %1161 = vmatprep.mubr.bf16.mxu1 %v2678_v46  ;;  %v634_v51 = vmul.f32 %v1810_v23, %v2324_v16  ;;  %v770_v44 = vadd.f32 %v2373_v56, %v713_v36  ;;  %v2680_v16 = vld [vmem:[#allocation13_spill] sm:$0xff]  ;;  %v820_v50 = vshrl.u32 %v819_v49, 7 }
 0x1a9   :  { %1823 = vrsqrt.f32 %v561_v59  ;;  %v714_v0 = vmul.f32 %v2369_v35, %v657_v29  ;;  %v786_v30 = vpack.c.bf16 %v747_v58, %v746_v52 }
 0x1aa   :  { %v1812_v17 = vpop.eup %1811  ;;  %v691_v19 = vmul.f32 %v2369_v35, %v634_v51  ;;  %v821_v27 = vsub.s32 0, %v820_v50  ;;  %v825_v60 = vsub.s32 1, %v820_v50 }
 0x1ab   :  { %v1814_v54 = vpop.eup %1813  ;;  %v771_v38 = vadd.f32 %v2373_v56, %v714_v0  ;;  %v635_v5 = vmul.f32 %v1812_v17, %v2327_v40 }
 0x1ac   :  { %v658_v12 = vmul.f32 %v1814_v54, %v2679_v41  ;;  %v748_v24 = vadd.f32 %v2373_v56, %v691_v19 }
 0x1ad   :  { %v798_v13 = vpack.c.bf16 %v771_v38, %v770_v44  ;;  %v692_v4 = vmul.f32 %v2369_v35, %v635_v5 }
 0x1ae   :  { %v1816_v62 = vpop.eup %1815  ;;  %v715_v9 = vmul.f32 %v2369_v35, %v658_v12 }
 0x1af   :  { %v1818_v53 = vpop.eup %1817  ;;  %1042 = vmatmul.mubr.bf16.gmra.mxu0 %v786_v30  ;;  %1162 = vmatmul.mubr.bf16.gmra.mxu1 %v798_v13  ;;  %v659_v1 = vmul.f32 %v1816_v62, %v2680_v16  ;;  %v749_v40 = vadd.f32 %v2373_v56, %v692_v4 }
 0x1b0   :  { %1051 = vmatprep.mubr.bf16.mxu0 %v2678_v46  ;;  %1171 = vmatprep.mubr.bf16.mxu1 %v2678_v46  ;;  %v772_v8 = vadd.f32 %v2373_v56, %v715_v9  ;;  %v636_v63 = vmul.f32 %v1818_v53, %v2681_v22 }
 0x1b1   :  { %v716_v6 = vmul.f32 %v2369_v35, %v659_v1  ;;  %v787_v2 = vpack.c.bf16 %v749_v40, %v748_v24 }
 0x1b2   :  { %v1820_v3 = vpop.eup %1819  ;;  %v693_v26 = vmul.f32 %v2369_v35, %v636_v63 }
 0x1b3   :  { %v1822_v25 = vpop.eup %1821  ;;  %v773_v39 = vadd.f32 %v2373_v56, %v716_v6  ;;  %v637_v15 = vmul.f32 %v1820_v3, %v2682_v47 }
 0x1b4   :  { %v660_v32 = vmul.f32 %v1822_v25, %v2683_v43  ;;  %v750_v34 = vadd.f32 %v2373_v56, %v693_v26 }
 0x1b5   :  { %v799_v14 = vpack.c.bf16 %v773_v39, %v772_v8  ;;  %v694_v33 = vmul.f32 %v2369_v35, %v637_v15 }
 0x1b6   :  { %v1824_v42 = vpop.eup %1823  ;;  %v717_v7 = vmul.f32 %v2369_v35, %v660_v32 }
 0x1b7   :  { %1052 = vmatmul.mubr.bf16.gmra.mxu0 %v787_v2  ;;  %1172 = vmatmul.mubr.bf16.gmra.mxu1 %v799_v14  ;;  %v661_v11 = vmul.f32 %v1824_v42, %v2684_v20  ;;  %v751_v37 = vadd.f32 %v2373_v56, %v694_v33 }
 0x1b8   :  { %1061 = vmatprep.mubr.bf16.mxu0 %v2678_v46  ;;  %1181 = vmatprep.mubr.bf16.mxu1 %v2678_v46  ;;  %v774_v21 = vadd.f32 %v2373_v56, %v717_v7  ;;  %v817_v46 = vld [vmem:[%s2662_s4] sm:$0x3]  ;;  %s1917_s4 = smov [#allocation8]  }
 0x1b9   :  { %v718_v45 = vmul.f32 %v2369_v35, %v661_v11  ;;  %v788_v61 = vpack.c.bf16 %v751_v37, %v750_v34  ;;  %v2548_v18 = vrot.slane %v817_v46, %v821_v27  ;;  %v2550_v35 = vrot.slane %v817_v46, %v825_v60  ;;  %s1547_s11 = sshll.u32 %s1917_s4, 4  ;;  %s1548_s11 = int_to_ptr.vmem [resolvable:$true] %s1547_s11 }
 0x1ba   :  { %s1885_s12 = scalar_lea.vmem %s1548_s11, 6400  ;;  %p1890_p2 = scmp.lt.s32.totalorder %s1548_s11, %s1548_s11 }
 0x1bb   :  { %v775_v48 = vadd.f32 %v2373_v56, %v718_v45  ;;  %p1886_p1 = scmp.ne.s32.totalorder %s1548_s11, %s1885_s12  ;;  %p1891_p3 = scmp.lt.s32.totalorder %s1885_s12, %s1885_s12 }
 0x1bd   :  { %v800_v57 = vpack.c.bf16 %v775_v48, %v774_v21  ;;  %p1892_p4 = por %p1891_p3, %p1890_p2 }
 0x1bf   :  { %1062 = vmatmul.mubr.bf16.gmra.mxu0 %v788_v61  ;;  %1182 = vmatmul.mubr.bf16.gmra.mxu1 %v800_v57  ;;  %p1893_p5 = pnand %p1892_p4, %p1886_p1 }
 0x21f   :  { %v943_v31 = vpop.f32.mrf.mxu0 }
 0x220   :  { %v944_v56 = vadd.f32 %v943_v31, %v2548_v18 }
 0x221   :  { %v945_v10 = vpop.f32.mrf.mxu0 }
 0x222   :  { %v946_v55 = vadd.f32 %v945_v10, %v2550_v35 }
 0x223   :  { %v947_v23 = vpop.f32.mrf.mxu0 }
 0x224   :  { %v1628_v59 = vpack.c.bf16 %v946_v55, %v944_v56  ;;  %v948_v29 = vadd.f32 %v947_v23, %v2548_v18 }
 0x225   :  { %v949_v28 = vpop.f32.mrf.mxu0 }
 0x226   :  { %1492 = vst [vmem:[#allocation8] sm:$0xff] %v1628_v59  ;;  %v950_v36 = vadd.f32 %v949_v28, %v2550_v35 }
 0x227   :  { %v953_v58 = vpop.f32.mrf.mxu0  ;;  %v1073_v0 = vpop.f32.mrf.mxu1 }
 0x228   :  { %v1629_v17 = vpack.c.bf16 %v950_v36, %v948_v29  ;;  %v954_v52 = vadd.f32 %v953_v58, %v2548_v18  ;;  %v1074_v44 = vadd.f32 %v1073_v0, %v2548_v18 }
 0x229   :  { %v955_v51 = vpop.f32.mrf.mxu0  ;;  %v1075_v54 = vpop.f32.mrf.mxu1 }
 0x22a   :  { %1493 = vst [vmem:[#allocation8 + $0x8] sm:$0xff] %v1629_v17  ;;  %v956_v38 = vadd.f32 %v955_v51, %v2550_v35  ;;  %v1076_v5 = vadd.f32 %v1075_v54, %v2550_v35 }
 0x22b   :  { %v957_v41 = vpop.f32.mrf.mxu0  ;;  %v1077_v12 = vpop.f32.mrf.mxu1 }
 0x22c   :  { %v1630_v30 = vpack.c.bf16 %v956_v38, %v954_v52  ;;  %v1654_v13 = vpack.c.bf16 %v1076_v5, %v1074_v44  ;;  %v958_v19 = vadd.f32 %v957_v41, %v2548_v18  ;;  %v1078_v53 = vadd.f32 %v1077_v12, %v2548_v18 }
 0x22d   :  { %v959_v4 = vpop.f32.mrf.mxu0  ;;  %v1079_v62 = vpop.f32.mrf.mxu1 }
 0x22e   :  { %1494 = vst [vmem:[#allocation8 + $0x10] sm:$0xff] %v1630_v30  ;;  %1518 = vst [vmem:[#allocation8 + $0xd0] sm:$0xff] %v1654_v13  ;;  %v960_v16 = vadd.f32 %v959_v4, %v2550_v35  ;;  %v1080_v1 = vadd.f32 %v1079_v62, %v2550_v35 }
 0x22f   :  { %v963_v9 = vpop.f32.mrf.mxu0  ;;  %v1083_v40 = vpop.f32.mrf.mxu1 }
 0x230   :  { %v1631_v6 = vpack.c.bf16 %v960_v16, %v958_v19  ;;  %v1655_v3 = vpack.c.bf16 %v1080_v1, %v1078_v53  ;;  %v964_v8 = vadd.f32 %v963_v9, %v2548_v18  ;;  %v1084_v39 = vadd.f32 %v1083_v40, %v2548_v18 }
 0x231   :  { %v965_v24 = vpop.f32.mrf.mxu0  ;;  %v1085_v25 = vpop.f32.mrf.mxu1 }
 0x232   :  { %1495 = vst [vmem:[#allocation8 + $0x18] sm:$0xff] %v1631_v6  ;;  %1519 = vst [vmem:[#allocation8 + $0xd8] sm:$0xff] %v1655_v3  ;;  %v966_v22 = vadd.f32 %v965_v24, %v2550_v35  ;;  %v1086_v63 = vadd.f32 %v1085_v25, %v2550_v35 }
 0x233   :  { %v967_v47 = vpop.f32.mrf.mxu0  ;;  %v1087_v15 = vpop.f32.mrf.mxu1 }
 0x234   :  { %v1632_v43 = vpack.c.bf16 %v966_v22, %v964_v8  ;;  %v1656_v32 = vpack.c.bf16 %v1086_v63, %v1084_v39  ;;  %v968_v33 = vadd.f32 %v967_v47, %v2548_v18  ;;  %v1088_v42 = vadd.f32 %v1087_v15, %v2548_v18 }
 0x235   :  { %v969_v2 = vpop.f32.mrf.mxu0  ;;  %v1089_v14 = vpop.f32.mrf.mxu1 }
 0x236   :  { %1496 = vst [vmem:[#allocation8 + $0x20] sm:$0xff] %v1632_v43  ;;  %1520 = vst [vmem:[#allocation8 + $0xe0] sm:$0xff] %v1656_v32  ;;  %v970_v26 = vadd.f32 %v969_v2, %v2550_v35  ;;  %v1090_v20 = vadd.f32 %v1089_v14, %v2550_v35 }
 0x237   :  { %v973_v11 = vpop.f32.mrf.mxu0  ;;  %v1093_v7 = vpop.f32.mrf.mxu1 }
 0x238   :  { %v1633_v37 = vpack.c.bf16 %v970_v26, %v968_v33  ;;  %v1657_v45 = vpack.c.bf16 %v1090_v20, %v1088_v42  ;;  %v974_v48 = vadd.f32 %v973_v11, %v2548_v18  ;;  %v1094_v61 = vadd.f32 %v1093_v7, %v2548_v18 }
 0x239   :  { %v975_v34 = vpop.f32.mrf.mxu0  ;;  %v1095_v21 = vpop.f32.mrf.mxu1 }
 0x23a   :  { %1497 = vst [vmem:[#allocation8 + $0x28] sm:$0xff] %v1633_v37  ;;  %1521 = vst [vmem:[#allocation8 + $0xe8] sm:$0xff] %v1657_v45  ;;  %v976_v57 = vadd.f32 %v975_v34, %v2550_v35  ;;  %v1096_v49 = vadd.f32 %v1095_v21, %v2550_v35 }
 0x23b   :  { %v977_v50 = vpop.f32.mrf.mxu0  ;;  %v1097_v27 = vpop.f32.mrf.mxu1 }
 0x23c   :  { %v1634_v60 = vpack.c.bf16 %v976_v57, %v974_v48  ;;  %v1658_v46 = vpack.c.bf16 %v1096_v49, %v1094_v61  ;;  %v978_v56 = vadd.f32 %v977_v50, %v2548_v18  ;;  %v1098_v55 = vadd.f32 %v1097_v27, %v2548_v18 }
 0x23d   :  { %v979_v31 = vpop.f32.mrf.mxu0  ;;  %v1099_v10 = vpop.f32.mrf.mxu1 }
 0x23e   :  { %1498 = vst [vmem:[#allocation8 + $0x30] sm:$0xff] %v1634_v60  ;;  %1522 = vst [vmem:[#allocation8 + $0xf0] sm:$0xff] %v1658_v46  ;;  %v980_v23 = vadd.f32 %v979_v31, %v2550_v35  ;;  %v1100_v59 = vadd.f32 %v1099_v10, %v2550_v35 }
 0x23f   :  { %v983_v28 = vpop.f32.mrf.mxu0  ;;  %v1103_v29 = vpop.f32.mrf.mxu1 }
 0x240   :  { %v1635_v36 = vpack.c.bf16 %v980_v23, %v978_v56  ;;  %v1659_v58 = vpack.c.bf16 %v1100_v59, %v1098_v55  ;;  %v984_v51 = vadd.f32 %v983_v28, %v2548_v18  ;;  %v1104_v54 = vadd.f32 %v1103_v29, %v2548_v18 }
 0x241   :  { %v985_v0 = vpop.f32.mrf.mxu0  ;;  %v1105_v17 = vpop.f32.mrf.mxu1 }
 0x242   :  { %1499 = vst [vmem:[#allocation8 + $0x38] sm:$0xff] %v1635_v36  ;;  %1523 = vst [vmem:[#allocation8 + $0xf8] sm:$0xff] %v1659_v58  ;;  %v986_v52 = vadd.f32 %v985_v0, %v2550_v35  ;;  %v1106_v44 = vadd.f32 %v1105_v17, %v2550_v35 }
 0x243   :  { %v987_v38 = vpop.f32.mrf.mxu0  ;;  %v1107_v5 = vpop.f32.mrf.mxu1 }
 0x244   :  { %v1636_v41 = vpack.c.bf16 %v986_v52, %v984_v51  ;;  %v1660_v12 = vpack.c.bf16 %v1106_v44, %v1104_v54  ;;  %v988_v4 = vadd.f32 %v987_v38, %v2548_v18  ;;  %v1108_v62 = vadd.f32 %v1107_v5, %v2548_v18 }
 0x245   :  { %v989_v30 = vpop.f32.mrf.mxu0  ;;  %v1109_v13 = vpop.f32.mrf.mxu1 }
 0x246   :  { %1500 = vst [vmem:[#allocation8 + $0x40] sm:$0xff] %v1636_v41  ;;  %1524 = vst [vmem:[#allocation8 + $0x100] sm:$0xff] %v1660_v12  ;;  %v990_v19 = vadd.f32 %v989_v30, %v2550_v35  ;;  %v1110_v53 = vadd.f32 %v1109_v13, %v2550_v35 }
 0x247   :  { %v993_v16 = vpop.f32.mrf.mxu0  ;;  %v1113_v1 = vpop.f32.mrf.mxu1 }
 0x248   :  { %v1637_v9 = vpack.c.bf16 %v990_v19, %v988_v4  ;;  %v1661_v40 = vpack.c.bf16 %v1110_v53, %v1108_v62  ;;  %v994_v24 = vadd.f32 %v993_v16, %v2548_v18  ;;  %v1114_v25 = vadd.f32 %v1113_v1, %v2548_v18 }
 0x249   :  { %v995_v6 = vpop.f32.mrf.mxu0  ;;  %v1115_v3 = vpop.f32.mrf.mxu1 }
 0x24a   :  { %1501 = vst [vmem:[#allocation8 + $0x48] sm:$0xff] %v1637_v9  ;;  %1525 = vst [vmem:[#allocation8 + $0x108] sm:$0xff] %v1661_v40  ;;  %v996_v8 = vadd.f32 %v995_v6, %v2550_v35  ;;  %v1116_v39 = vadd.f32 %v1115_v3, %v2550_v35 }
 0x24b   :  { %v997_v22 = vpop.f32.mrf.mxu0  ;;  %v1117_v63 = vpop.f32.mrf.mxu1 }
 0x24c   :  { %v1638_v47 = vpack.c.bf16 %v996_v8, %v994_v24  ;;  %v1662_v15 = vpack.c.bf16 %v1116_v39, %v1114_v25  ;;  %v998_v2 = vadd.f32 %v997_v22, %v2548_v18  ;;  %v1118_v14 = vadd.f32 %v1117_v63, %v2548_v18 }
 0x24d   :  { %v999_v43 = vpop.f32.mrf.mxu0  ;;  %v1119_v32 = vpop.f32.mrf.mxu1 }
 0x24e   :  { %1502 = vst [vmem:[#allocation8 + $0x50] sm:$0xff] %v1638_v47  ;;  %1526 = vst [vmem:[#allocation8 + $0x110] sm:$0xff] %v1662_v15  ;;  %v1000_v33 = vadd.f32 %v999_v43, %v2550_v35  ;;  %v1120_v42 = vadd.f32 %v1119_v32, %v2550_v35 }
 0x24f   :  { %v1003_v26 = vpop.f32.mrf.mxu0  ;;  %v1123_v20 = vpop.f32.mrf.mxu1 }
 0x250   :  { %v1639_v11 = vpack.c.bf16 %v1000_v33, %v998_v2  ;;  %v1663_v7 = vpack.c.bf16 %v1120_v42, %v1118_v14  ;;  %v1004_v34 = vadd.f32 %v1003_v26, %v2548_v18  ;;  %v1124_v21 = vadd.f32 %v1123_v20, %v2548_v18 }
 0x251   :  { %v1005_v37 = vpop.f32.mrf.mxu0  ;;  %v1125_v45 = vpop.f32.mrf.mxu1 }
 0x252   :  { %1503 = vst [vmem:[#allocation8 + $0x58] sm:$0xff] %v1639_v11  ;;  %1527 = vst [vmem:[#allocation8 + $0x118] sm:$0xff] %v1663_v7  ;;  %v1006_v48 = vadd.f32 %v1005_v37, %v2550_v35  ;;  %v1126_v61 = vadd.f32 %v1125_v45, %v2550_v35 }
 0x253   :  { %v1007_v57 = vpop.f32.mrf.mxu0  ;;  %v1127_v49 = vpop.f32.mrf.mxu1 }
 0x254   :  { %v1640_v50 = vpack.c.bf16 %v1006_v48, %v1004_v34  ;;  %v1664_v27 = vpack.c.bf16 %v1126_v61, %v1124_v21  ;;  %v1008_v31 = vadd.f32 %v1007_v57, %v2548_v18  ;;  %v1128_v10 = vadd.f32 %v1127_v49, %v2548_v18 }
 0x255   :  { %v1009_v60 = vpop.f32.mrf.mxu0  ;;  %v1129_v46 = vpop.f32.mrf.mxu1 }
 0x256   :  { %1504 = vst [vmem:[#allocation8 + $0x60] sm:$0xff] %v1640_v50  ;;  %1528 = vst [vmem:[#allocation8 + $0x120] sm:$0xff] %v1664_v27  ;;  %v1010_v56 = vadd.f32 %v1009_v60, %v2550_v35  ;;  %v1130_v55 = vadd.f32 %v1129_v46, %v2550_v35 }
 0x257   :  { %v1013_v23 = vpop.f32.mrf.mxu0  ;;  %v1133_v59 = vpop.f32.mrf.mxu1 }
 0x258   :  { %v1641_v28 = vpack.c.bf16 %v1010_v56, %v1008_v31  ;;  %v1665_v29 = vpack.c.bf16 %v1130_v55, %v1128_v10  ;;  %v1014_v0 = vadd.f32 %v1013_v23, %v2548_v18  ;;  %v1134_v17 = vadd.f32 %v1133_v59, %v2548_v18 }
 0x259   :  { %v1015_v36 = vpop.f32.mrf.mxu0  ;;  %v1135_v58 = vpop.f32.mrf.mxu1 }
 0x25a   :  { %1505 = vst [vmem:[#allocation8 + $0x68] sm:$0xff] %v1641_v28  ;;  %1529 = vst [vmem:[#allocation8 + $0x128] sm:$0xff] %v1665_v29  ;;  %v1016_v51 = vadd.f32 %v1015_v36, %v2550_v35  ;;  %v1136_v54 = vadd.f32 %v1135_v58, %v2550_v35 }
 0x25b   :  { %v1017_v52 = vpop.f32.mrf.mxu0  ;;  %v1137_v44 = vpop.f32.mrf.mxu1 }
 0x25c   :  { %v1642_v38 = vpack.c.bf16 %v1016_v51, %v1014_v0  ;;  %v1666_v5 = vpack.c.bf16 %v1136_v54, %v1134_v17  ;;  %v1018_v30 = vadd.f32 %v1017_v52, %v2548_v18  ;;  %v1138_v13 = vadd.f32 %v1137_v44, %v2548_v18 }
 0x25d   :  { %v1019_v41 = vpop.f32.mrf.mxu0  ;;  %v1139_v12 = vpop.f32.mrf.mxu1 }
 0x25e   :  { %1506 = vst [vmem:[#allocation8 + $0x70] sm:$0xff] %v1642_v38  ;;  %1530 = vst [vmem:[#allocation8 + $0x130] sm:$0xff] %v1666_v5  ;;  %v1020_v4 = vadd.f32 %v1019_v41, %v2550_v35  ;;  %v1140_v62 = vadd.f32 %v1139_v12, %v2550_v35 }
 0x25f   :  { %v1023_v19 = vpop.f32.mrf.mxu0  ;;  %v1143_v53 = vpop.f32.mrf.mxu1 }
 0x260   :  { %v1643_v16 = vpack.c.bf16 %v1020_v4, %v1018_v30  ;;  %v1667_v1 = vpack.c.bf16 %v1140_v62, %v1138_v13  ;;  %v1024_v6 = vadd.f32 %v1023_v19, %v2548_v18  ;;  %v1144_v3 = vadd.f32 %v1143_v53, %v2548_v18 }
 0x261   :  { %v1025_v9 = vpop.f32.mrf.mxu0  ;;  %v1145_v40 = vpop.f32.mrf.mxu1 }
 0x262   :  { %1507 = vst [vmem:[#allocation8 + $0x78] sm:$0xff] %v1643_v16  ;;  %1531 = vst [vmem:[#allocation8 + $0x138] sm:$0xff] %v1667_v1  ;;  %v1026_v24 = vadd.f32 %v1025_v9, %v2550_v35  ;;  %v1146_v25 = vadd.f32 %v1145_v40, %v2550_v35 }
 0x263   :  { %v1027_v8 = vpop.f32.mrf.mxu0  ;;  %v1147_v39 = vpop.f32.mrf.mxu1 }
 0x264   :  { %v1644_v22 = vpack.c.bf16 %v1026_v24, %v1024_v6  ;;  %v1668_v63 = vpack.c.bf16 %v1146_v25, %v1144_v3  ;;  %v1028_v43 = vadd.f32 %v1027_v8, %v2548_v18  ;;  %v1148_v32 = vadd.f32 %v1147_v39, %v2548_v18 }
 0x265   :  { %v1029_v47 = vpop.f32.mrf.mxu0  ;;  %v1149_v15 = vpop.f32.mrf.mxu1 }
 0x266   :  { %1508 = vst [vmem:[#allocation8 + $0x80] sm:$0xff] %v1644_v22  ;;  %1532 = vst [vmem:[#allocation8 + $0x140] sm:$0xff] %v1668_v63  ;;  %v1030_v2 = vadd.f32 %v1029_v47, %v2550_v35  ;;  %v1150_v14 = vadd.f32 %v1149_v15, %v2550_v35 }
 0x267   :  { %v1033_v33 = vpop.f32.mrf.mxu0  ;;  %v1153_v42 = vpop.f32.mrf.mxu1 }
 0x268   :  { %v1645_v26 = vpack.c.bf16 %v1030_v2, %v1028_v43  ;;  %v1669_v20 = vpack.c.bf16 %v1150_v14, %v1148_v32  ;;  %v1034_v37 = vadd.f32 %v1033_v33, %v2548_v18  ;;  %v1154_v45 = vadd.f32 %v1153_v42, %v2548_v18 }
 0x269   :  { %v1035_v11 = vpop.f32.mrf.mxu0  ;;  %v1155_v7 = vpop.f32.mrf.mxu1 }
 0x26a   :  { %1509 = vst [vmem:[#allocation8 + $0x88] sm:$0xff] %v1645_v26  ;;  %1533 = vst [vmem:[#allocation8 + $0x148] sm:$0xff] %v1669_v20  ;;  %v1036_v34 = vadd.f32 %v1035_v11, %v2550_v35  ;;  %v1156_v21 = vadd.f32 %v1155_v7, %v2550_v35 }
 0x26b   :  { %v1037_v48 = vpop.f32.mrf.mxu0  ;;  %v1157_v61 = vpop.f32.mrf.mxu1 }
 0x26c   :  { %v1646_v57 = vpack.c.bf16 %v1036_v34, %v1034_v37  ;;  %v1670_v49 = vpack.c.bf16 %v1156_v21, %v1154_v45  ;;  %v1038_v60 = vadd.f32 %v1037_v48, %v2548_v18  ;;  %v1158_v46 = vadd.f32 %v1157_v61, %v2548_v18 }
 0x26d   :  { %v1039_v50 = vpop.f32.mrf.mxu0  ;;  %v1159_v27 = vpop.f32.mrf.mxu1 }
 0x26e   :  { %1510 = vst [vmem:[#allocation8 + $0x90] sm:$0xff] %v1646_v57  ;;  %1534 = vst [vmem:[#allocation8 + $0x150] sm:$0xff] %v1670_v49  ;;  %v1040_v31 = vadd.f32 %v1039_v50, %v2550_v35  ;;  %v1160_v10 = vadd.f32 %v1159_v27, %v2550_v35 }
 0x26f   :  { %v1043_v56 = vpop.f32.mrf.mxu0  ;;  %v1163_v55 = vpop.f32.mrf.mxu1 }
 0x270   :  { %v1647_v23 = vpack.c.bf16 %v1040_v31, %v1038_v60  ;;  %v1671_v59 = vpack.c.bf16 %v1160_v10, %v1158_v46  ;;  %v1044_v36 = vadd.f32 %v1043_v56, %v2548_v18  ;;  %v1164_v58 = vadd.f32 %v1163_v55, %v2548_v18 }
 0x271   :  { %v1045_v28 = vpop.f32.mrf.mxu0  ;;  %v1165_v29 = vpop.f32.mrf.mxu1 }
 0x272   :  { %1511 = vst [vmem:[#allocation8 + $0x98] sm:$0xff] %v1647_v23  ;;  %1535 = vst [vmem:[#allocation8 + $0x158] sm:$0xff] %v1671_v59  ;;  %v1046_v0 = vadd.f32 %v1045_v28, %v2550_v35  ;;  %v1166_v17 = vadd.f32 %v1165_v29, %v2550_v35 }
 0x273   :  { %v1047_v51 = vpop.f32.mrf.mxu0  ;;  %v1167_v54 = vpop.f32.mrf.mxu1 }
 0x274   :  { %v1648_v52 = vpack.c.bf16 %v1046_v0, %v1044_v36  ;;  %v1672_v44 = vpack.c.bf16 %v1166_v17, %v1164_v58  ;;  %v1048_v41 = vadd.f32 %v1047_v51, %v2548_v18  ;;  %v1168_v12 = vadd.f32 %v1167_v54, %v2548_v18 }
 0x275   :  { %v1049_v38 = vpop.f32.mrf.mxu0  ;;  %v1169_v5 = vpop.f32.mrf.mxu1 }
 0x276   :  { %1512 = vst [vmem:[#allocation8 + $0xa0] sm:$0xff] %v1648_v52  ;;  %1536 = vst [vmem:[#allocation8 + $0x160] sm:$0xff] %v1672_v44  ;;  %v1050_v30 = vadd.f32 %v1049_v38, %v2550_v35  ;;  %v1170_v13 = vadd.f32 %v1169_v5, %v2550_v35 }
 0x277   :  { %v1053_v4 = vpop.f32.mrf.mxu0  ;;  %v1173_v62 = vpop.f32.mrf.mxu1 }
 0x278   :  { %v1649_v19 = vpack.c.bf16 %v1050_v30, %v1048_v41  ;;  %v1673_v53 = vpack.c.bf16 %v1170_v13, %v1168_v12  ;;  %v1054_v9 = vadd.f32 %v1053_v4, %v2548_v18  ;;  %v1174_v40 = vadd.f32 %v1173_v62, %v2548_v18 }
 0x279   :  { %v1055_v16 = vpop.f32.mrf.mxu0  ;;  %v1175_v1 = vpop.f32.mrf.mxu1 }
 0x27a   :  { %1513 = vst [vmem:[#allocation8 + $0xa8] sm:$0xff] %v1649_v19  ;;  %1537 = vst [vmem:[#allocation8 + $0x168] sm:$0xff] %v1673_v53  ;;  %v1056_v6 = vadd.f32 %v1055_v16, %v2550_v35  ;;  %v1176_v3 = vadd.f32 %v1175_v1, %v2550_v35 }
 0x27b   :  { %v1057_v24 = vpop.f32.mrf.mxu0  ;;  %v1177_v25 = vpop.f32.mrf.mxu1 }
 0x27c   :  { %v1650_v8 = vpack.c.bf16 %v1056_v6, %v1054_v9  ;;  %v1674_v39 = vpack.c.bf16 %v1176_v3, %v1174_v40  ;;  %v1058_v47 = vadd.f32 %v1057_v24, %v2548_v18  ;;  %v1178_v15 = vadd.f32 %v1177_v25, %v2548_v18 }
 0x27d   :  { %v1059_v22 = vpop.f32.mrf.mxu0  ;;  %v1179_v63 = vpop.f32.mrf.mxu1 }
 0x27e   :  { %1514 = vst [vmem:[#allocation8 + $0xb0] sm:$0xff] %v1650_v8  ;;  %1538 = vst [vmem:[#allocation8 + $0x170] sm:$0xff] %v1674_v39  ;;  %v1060_v43 = vadd.f32 %v1059_v22, %v2550_v35  ;;  %v1180_v32 = vadd.f32 %v1179_v63, %v2550_v35 }
 0x27f   :  { %v1063_v2 = vpop.f32.mrf.mxu0  ;;  %v1183_v14 = vpop.f32.mrf.mxu1 }
 0x280   :  { %v1651_v33 = vpack.c.bf16 %v1060_v43, %v1058_v47  ;;  %v1675_v42 = vpack.c.bf16 %v1180_v32, %v1178_v15  ;;  %v1064_v11 = vadd.f32 %v1063_v2, %v2548_v18  ;;  %v1184_v7 = vadd.f32 %v1183_v14, %v2548_v18 }
 0x281   :  { %v1065_v26 = vpop.f32.mrf.mxu0  ;;  %v1185_v20 = vpop.f32.mrf.mxu1 }
 0x282   :  { %1515 = vst [vmem:[#allocation8 + $0xb8] sm:$0xff] %v1651_v33  ;;  %1539 = vst [vmem:[#allocation8 + $0x178] sm:$0xff] %v1675_v42  ;;  %v1066_v37 = vadd.f32 %v1065_v26, %v2550_v35  ;;  %v1186_v45 = vadd.f32 %v1185_v20, %v2550_v35 }
 0x283   :  { %v1067_v34 = vpop.f32.mrf.mxu0  ;;  %v1187_v21 = vpop.f32.mrf.mxu1 }
 0x284   :  { %v1652_v48 = vpack.c.bf16 %v1066_v37, %v1064_v11  ;;  %v1676_v61 = vpack.c.bf16 %v1186_v45, %v1184_v7  ;;  %v1068_v50 = vadd.f32 %v1067_v34, %v2548_v18  ;;  %v1188_v27 = vadd.f32 %v1187_v21, %v2548_v18 }
 0x285   :  { %v1069_v57 = vpop.f32.mrf.mxu0  ;;  %v1189_v49 = vpop.f32.mrf.mxu1 }
 0x286   :  { %1516 = vst [vmem:[#allocation8 + $0xc0] sm:$0xff] %v1652_v48  ;;  %1540 = vst [vmem:[#allocation8 + $0x180] sm:$0xff] %v1676_v61  ;;  %v1070_v60 = vadd.f32 %v1069_v57, %v2550_v35  ;;  %v1190_v46 = vadd.f32 %v1189_v49, %v2550_v35 }
 0x288   :  { %v1653_v31 = vpack.c.bf16 %v1070_v60, %v1068_v50  ;;  %v1677_v10 = vpack.c.bf16 %v1190_v46, %v1188_v27 }
 0x28a   :  { %1517 = vst [vmem:[#allocation8 + $0xc8] sm:$0xff] %v1653_v31  ;;  %1541 = vst [vmem:[#allocation8 + $0x188] sm:$0xff] %v1677_v10 }
 0x28b   :  { %1896 = shalt.err (!%p1893_p5)
}
 0x28c   :  { %1553 = dma.vmem_to_hbm [thread:$0]  %s1548_s11, 6400, %s2663_s5, [#allocation4], %s1913_s27, %s1913_s27, %s1914_s28  }
 0x28d   :  { %1909 = dma.done.wait [#allocation4], 6400  }
 0x28e   :  { %1910 = vsyncadd [#allocation4], 4294960896 }
 0x28f   :  { %1557 = vsyncpa [#allocation3], 1 }
 0x290   :  { %1558 = vsyncpa [#allocation6], 1 }
 0x291   :  { %1559 = vsyncpa [#allocation4], 1 }

</bundles_post_ra>
